<compile_context>
chip_gen: v6e
topology: v6e:2x2x1
jax: 0.10.0
libtpu: 0.0.40
codegen_flags: <defaults>
</compile_context>

<pallas_src>
import jax
import jax.numpy as jnp
from jax import lax
from jax.experimental import pallas as pl
from jax.experimental.pallas import tpu as pltpu

KH = KW = 3  # kernel_size=3, stride=1, padding=1, dilation=1


def _csdn_kernel(main_ref, halo0_ref, halo1_ref, dww_ref, pww_ref, pwb_ref,
                 o_ref, xs_ref):
    # main_ref : (1, TH, W+2, Cin)  padded NHWC rows [h*TH, h*TH+TH)
    # halo*_ref: (1, 1,  W+2, Cin)  padded rows h*TH+TH and h*TH+TH+1
    # dww_ref  : (3, 3, Cin)        depthwise weights
    # pww_ref  : (Cout, Cin)        pointwise weights
    # pwb_ref  : (Cout, 1)          pointwise bias (depthwise bias folded in)
    # o_ref    : (1, Cout, TH*W)    lane-dense flat NCHW output block
    # xs_ref   : (TH+2, W+2, Cin)   VMEM scratch: main + halo assembled
    TH = main_ref.shape[1]
    Wp = main_ref.shape[2]
    Cin = main_ref.shape[3]
    W = Wp - 2

    # Assemble the TH+2 padded rows this tile needs (leading-axis stores only).
    xs_ref[0:TH] = main_ref[0]
    xs_ref[TH] = halo0_ref[0, 0]
    xs_ref[TH + 1] = halo1_ref[0, 0]

    x = xs_ref[...].astype(jnp.float32)                  # (TH+2, W+2, Cin)
    dww = dww_ref[...].astype(jnp.float32)               # (3, 3, Cin), loaded once

    # Hoist the 3 kw-shifted (sublane) copies; kh slices the leading axis which
    # needs no relayout -> 3 relayouts instead of 9.
    x_kw = [x[:, kw:kw + W, :] for kw in range(KW)]      # each (TH+2, W, Cin)

    acc = None
    for kh in range(KH):
        for kw in range(KW):
            term = x_kw[kw][kh:kh + TH] * dww[kh, kw, :]
            acc = term if acc is None else acc + term     # (TH, W, Cin)

    # Pointwise 1x1 conv on the MXU, oriented so output lanes = TH*W (unmasked
    # vst into the flat NCHW output).
    mxu_dtype = jnp.bfloat16 if xs_ref.dtype == jnp.bfloat16 else jnp.float32
    flat = acc.reshape(TH * W, Cin).astype(mxu_dtype)     # merge leading dims
    w_pw = pww_ref[...].astype(mxu_dtype)                 # (Cout, Cin)
    out = lax.dot_general(w_pw, flat,
                          dimension_numbers=(((1,), (1,)), ((), ())),
                          preferred_element_type=jnp.float32)  # (Cout, TH*W)
    out = out + pwb_ref[...].astype(jnp.float32)
    o_ref[0] = out.astype(o_ref.dtype)


def _pick_row_tile(H, W, itemsize, row_tile=None):
    """Pick TH: divides H; TH*W multiple of 128 (or TH == H); bounded VMEM tile."""
    if row_tile is not None:
        if H % row_tile or (row_tile != H and (row_tile * W) % 128):
            raise ValueError("row_tile must divide H and give 128-multiple lanes")
        return row_tile
    budget = 4 * 1024 * 1024  # per-tile scratch budget; amortizes grid-step overhead
    valid = [t for t in range(1, H + 1)
             if H % t == 0 and (t == H or (t * W) % 128 == 0)]
    # VMEM estimate: scratch (TH+2, W+2, Cin->128 lanes) with sublane rounding.
    est = lambda t: (t + 2) * (((W + 2) + 7) // 8 * 8) * 128 * max(itemsize, 4)
    under = [t for t in valid if est(t) <= budget]
    return max(under) if under else min(valid)


def csdn_tem_forward(x_nchw, dw_weight, dw_bias, pw_weight, pw_bias,
                     row_tile=None):
    """Forward pass of CSDN_Tem.

    x_nchw:    (N, Cin, H, W)       dw_weight: (Cin, 1, 3, 3)   dw_bias: (Cin,)
    pw_weight: (Cout, Cin, 1, 1)    pw_bias:   (Cout,)
    returns:   (N, Cout, H, W)
    """
    N, Cin, H, W = x_nchw.shape
    Cout = pw_weight.shape[0]
    TH = _pick_row_tile(H, W, jnp.dtype(x_nchw.dtype).itemsize, row_tile)
    nH = H // TH

    # NCHW -> NHWC + zero pad (fused by XLA into one pass over the input).
    x_nhwc = jnp.transpose(x_nchw, (0, 2, 3, 1))
    x_pad = jnp.pad(x_nhwc, ((0, 0), (1, 1), (1, 1), (0, 0)))   # (N, H+2, W+2, Cin)

    # Reformat weights; fold depthwise bias into the pointwise bias:
    #   point(depth(x) + db) = point(depth(x)) + pw_w @ db
    dww = jnp.transpose(dw_weight[:, 0, :, :], (1, 2, 0))       # (3, 3, Cin)
    pww2 = pw_weight[:, :, 0, 0]                                # (Cout, Cin)
    pwb2 = (pw_bias + pww2 @ dw_bias).reshape(Cout, 1)          # (Cout, 1)

    def main_map(n, h):
        return (n, h, 0, 0)

    def halo0_map(n, h):
        return (n, (h + 1) * TH, 0, 0)

    def halo1_map(n, h):
        return (n, (h + 1) * TH + 1, 0, 0)

    out_flat = pl.pallas_call(
        _csdn_kernel,
        out_shape=jax.ShapeDtypeStruct((N, Cout, H * W), x_nchw.dtype),
        grid_spec=pltpu.PrefetchScalarGridSpec(
            num_scalar_prefetch=0,
            grid=(N, nH),
            in_specs=[
                pl.BlockSpec((1, TH, W + 2, Cin), main_map),
                pl.BlockSpec((1, 1, W + 2, Cin), halo0_map),
                pl.BlockSpec((1, 1, W + 2, Cin), halo1_map),
                pl.BlockSpec((KH, KW, Cin), lambda n, h: (0, 0, 0)),
                pl.BlockSpec((Cout, Cin), lambda n, h: (0, 0)),
                pl.BlockSpec((Cout, 1), lambda n, h: (0, 0)),
            ],
            out_specs=pl.BlockSpec((1, Cout, TH * W), lambda n, h: (n, 0, h)),
            scratch_shapes=[pltpu.VMEM((TH + 2, W + 2, Cin), x_nchw.dtype)],
        ),
        compiler_params=pltpu.CompilerParams(
            dimension_semantics=("parallel", "parallel"),
            vmem_limit_bytes=32 * 1024 * 1024,
        ),
    )(x_pad, x_pad, x_pad, dww, pww2, pwb2)

    # Free reshape (contiguous split of the trailing dim) -> NCHW output.
    return out_flat.reshape(N, Cout, H, W)


def _reference(x_nchw, dw_weight, dw_bias, pw_weight, pw_bias):
    """Pure-JAX reference using lax.conv_general_dilated (matches PyTorch Conv2d)."""
    Cin = x_nchw.shape[1]
    out = lax.conv_general_dilated(
        x_nchw, dw_weight, window_strides=(1, 1), padding=((1, 1), (1, 1)),
        dimension_numbers=("NCHW", "OIHW", "NCHW"), feature_group_count=Cin)
    out = out + dw_bias.reshape(1, Cin, 1, 1)
    out = lax.conv_general_dilated(
        out, pw_weight, window_strides=(1, 1), padding=((0, 0), (0, 0)),
        dimension_numbers=("NCHW", "OIHW", "NCHW"))
    out = out + pw_bias.reshape(1, -1, 1, 1)
    return out


def _run_case(key, N, Cin, Cout, H, W, row_tile):
    k_x, k_dw, k_db, k_pw, k_pb = jax.random.split(key, 5)
    x = jax.random.normal(k_x, (N, Cin, H, W), dtype=jnp.float32)
    dw_w = 0.1 * jax.random.normal(k_dw, (Cin, 1, KH, KW), dtype=jnp.float32)
    dw_b = 0.1 * jax.random.normal(k_db, (Cin,), dtype=jnp.float32)
    pw_w = 0.1 * jax.random.normal(k_pw, (Cout, Cin, 1, 1), dtype=jnp.float32)
    pw_b = 0.1 * jax.random.normal(k_pb, (Cout,), dtype=jnp.float32)

    out = csdn_tem_forward(x, dw_w, dw_b, pw_w, pw_b, row_tile=row_tile)
    out = jax.block_until_ready(out)
    ref = _reference(x, dw_w, dw_b, pw_w, pw_b)
    assert out.shape == (N, Cout, H, W)
    assert jnp.allclose(out, ref, atol=1e-4, rtol=1e-4), "mismatch vs reference"


if __name__ == "__main__":
    key = jax.random.PRNGKey(0)
    k1, k2 = jax.random.split(key)
    # Multi-tile path: grid = (2, 2), exercises the cross-tile halo assembly.
    _run_case(k1, N=2, Cin=4, Cout=8, H=16, W=16, row_tile=8)
    # Auto tile pick / single-tile path, odd channel count (Zero-DCE first layer style).
    _run_case(k2, N=1, Cin=3, Cout=32, H=24, W=20, row_tile=None)
    print("KERNEL_OK")
</pallas_src>

<mosaic_0001>
module attributes {stable_mosaic.version = 11 : i64} {
  func.func @_csdn_kernel(%arg0: i32, %arg1: i32, %arg2: memref<1x8x18x4xf32, #tpu.memory_space<vmem>>, %arg3: memref<1x1x18x4xf32, #tpu.memory_space<vmem>>, %arg4: memref<1x1x18x4xf32, #tpu.memory_space<vmem>>, %arg5: memref<3x3x4xf32, #tpu.memory_space<vmem>>, %arg6: memref<8x4xf32, #tpu.memory_space<vmem>>, %arg7: memref<8x1xf32, #tpu.memory_space<vmem>>, %arg8: memref<1x8x128xf32, #tpu.memory_space<vmem>>, %arg9: memref<10x18x4xf32, #tpu.memory_space<vmem>>) attributes {dimension_semantics = [#tpu.dimension_semantics<parallel>, #tpu.dimension_semantics<parallel>], iteration_bounds = array<i64: 2, 2>, scalar_prefetch = 0 : i64, scratch_operands = 1 : i64, tpu.core_type = #tpu.core_type<tc>, window_params = [{transform_indices = @transform_0, window_bounds = array<i64: 1, 8, 18, 4>}, {transform_indices = @transform_1, window_bounds = array<i64: 1, 1, 18, 4>}, {transform_indices = @transform_2, window_bounds = array<i64: 1, 1, 18, 4>}, {pipeline_mode = #tpu.pipeline_mode<synchronous>, transform_indices = @transform_3, window_bounds = array<i64: 3, 3, 4>}, {pipeline_mode = #tpu.pipeline_mode<synchronous>, transform_indices = @transform_4, window_bounds = array<i64: 8, 4>}, {pipeline_mode = #tpu.pipeline_mode<synchronous>, transform_indices = @transform_5, window_bounds = array<i64: 8, 1>}, {transform_indices = @transform_6, window_bounds = array<i64: 1, 8, 128>}]} {
    %c0 = arith.constant 0 : index
    %c0_0 = arith.constant 0 : index
    %c0_1 = arith.constant 0 : index
    %c0_2 = arith.constant 0 : index
    %0 = vector.load %arg2[%c0, %c0_0, %c0_1, %c0_2] : memref<1x8x18x4xf32, #tpu.memory_space<vmem>>, vector<1x8x18x4xf32>
    %1 = vector.shape_cast %0 : vector<1x8x18x4xf32> to vector<8x18x4xf32>
    %c0_3 = arith.constant 0 : index
    %c0_4 = arith.constant 0 : index
    %c0_5 = arith.constant 0 : index
    %2 = vector.load %arg9[%c0_3, %c0_4, %c0_5] : memref<10x18x4xf32, #tpu.memory_space<vmem>>, vector<8x18x4xf32>
    tpu.vector_store %arg9[%c0_3, %c0_4, %c0_5], %1 {strides = array<i32>} : memref<10x18x4xf32, #tpu.memory_space<vmem>>, vector<8x18x4xf32>,
    %c0_6 = arith.constant 0 : index
    %c0_7 = arith.constant 0 : index
    %c0_8 = arith.constant 0 : index
    %c0_9 = arith.constant 0 : index
    %3 = vector.load %arg3[%c0_6, %c0_7, %c0_8, %c0_9] : memref<1x1x18x4xf32, #tpu.memory_space<vmem>>, vector<1x1x18x4xf32>
    %4 = vector.shape_cast %3 : vector<1x1x18x4xf32> to vector<18x4xf32>
    %c8 = arith.constant 8 : index
    %c0_10 = arith.constant 0 : index
    %c0_11 = arith.constant 0 : index
    %5 = vector.load %arg9[%c8, %c0_10, %c0_11] : memref<10x18x4xf32, #tpu.memory_space<vmem>>, vector<1x18x4xf32>
    %6 = vector.shape_cast %5 : vector<1x18x4xf32> to vector<18x4xf32>
    %7 = vector.shape_cast %4 : vector<18x4xf32> to vector<1x18x4xf32>
    tpu.vector_store %arg9[%c8, %c0_10, %c0_11], %7 {strides = array<i32>} : memref<10x18x4xf32, #tpu.memory_space<vmem>>, vector<1x18x4xf32>,
    %c0_12 = arith.constant 0 : index
    %c0_13 = arith.constant 0 : index
    %c0_14 = arith.constant 0 : index
    %c0_15 = arith.constant 0 : index
    %8 = vector.load %arg4[%c0_12, %c0_13, %c0_14, %c0_15] : memref<1x1x18x4xf32, #tpu.memory_space<vmem>>, vector<1x1x18x4xf32>
    %9 = vector.shape_cast %8 : vector<1x1x18x4xf32> to vector<18x4xf32>
    %c9 = arith.constant 9 : index
    %c0_16 = arith.constant 0 : index
    %c0_17 = arith.constant 0 : index
    %10 = vector.load %arg9[%c9, %c0_16, %c0_17] : memref<10x18x4xf32, #tpu.memory_space<vmem>>, vector<1x18x4xf32>
    %11 = vector.shape_cast %10 : vector<1x18x4xf32> to vector<18x4xf32>
    %12 = vector.shape_cast %9 : vector<18x4xf32> to vector<1x18x4xf32>
    tpu.vector_store %arg9[%c9, %c0_16, %c0_17], %12 {strides = array<i32>} : memref<10x18x4xf32, #tpu.memory_space<vmem>>, vector<1x18x4xf32>,
    %c0_18 = arith.constant 0 : index
    %c0_19 = arith.constant 0 : index
    %c0_20 = arith.constant 0 : index
    %13 = vector.load %arg9[%c0_18, %c0_19, %c0_20] : memref<10x18x4xf32, #tpu.memory_space<vmem>>, vector<10x18x4xf32>
    %c0_21 = arith.constant 0 : index
    %c0_22 = arith.constant 0 : index
    %c0_23 = arith.constant 0 : index
    %14 = vector.load %arg5[%c0_21, %c0_22, %c0_23] : memref<3x3x4xf32, #tpu.memory_space<vmem>>, vector<3x3x4xf32>
    %15 = vector.extract_strided_slice %13 {offsets = [0, 0, 0], sizes = [10, 16, 4], strides = [1, 1, 1]} : vector<10x18x4xf32> to vector<10x16x4xf32>
    %16 = vector.extract_strided_slice %13 {offsets = [0, 1, 0], sizes = [10, 16, 4], strides = [1, 1, 1]} : vector<10x18x4xf32> to vector<10x16x4xf32>
    %17 = vector.extract_strided_slice %13 {offsets = [0, 2, 0], sizes = [10, 16, 4], strides = [1, 1, 1]} : vector<10x18x4xf32> to vector<10x16x4xf32>
    %18 = vector.extract_strided_slice %15 {offsets = [0, 0, 0], sizes = [8, 16, 4], strides = [1, 1, 1]} : vector<10x16x4xf32> to vector<8x16x4xf32>
    %19 = vector.extract_strided_slice %14 {offsets = [0, 0, 0], sizes = [1, 1, 4], strides = [1, 1, 1]} : vector<3x3x4xf32> to vector<1x1x4xf32>
    %20 = vector.shape_cast %19 : vector<1x1x4xf32> to vector<4xf32>
    %21 = vector.shape_cast %20 : vector<4xf32> to vector<1x1x4xf32>
    %22 = vector.broadcast %21 : vector<1x1x4xf32> to vector<8x16x4xf32>
    %23 = arith.mulf %18, %22 : vector<8x16x4xf32>
    %24 = vector.extract_strided_slice %16 {offsets = [0, 0, 0], sizes = [8, 16, 4], strides = [1, 1, 1]} : vector<10x16x4xf32> to vector<8x16x4xf32>
    %25 = vector.extract_strided_slice %14 {offsets = [0, 1, 0], sizes = [1, 1, 4], strides = [1, 1, 1]} : vector<3x3x4xf32> to vector<1x1x4xf32>
    %26 = vector.shape_cast %25 : vector<1x1x4xf32> to vector<4xf32>
    %27 = vector.shape_cast %26 : vector<4xf32> to vector<1x1x4xf32>
    %28 = vector.broadcast %27 : vector<1x1x4xf32> to vector<8x16x4xf32>
    %29 = arith.mulf %24, %28 : vector<8x16x4xf32>
    %30 = arith.addf %23, %29 : vector<8x16x4xf32>
    %31 = vector.extract_strided_slice %17 {offsets = [0, 0, 0], sizes = [8, 16, 4], strides = [1, 1, 1]} : vector<10x16x4xf32> to vector<8x16x4xf32>
    %32 = vector.extract_strided_slice %14 {offsets = [0, 2, 0], sizes = [1, 1, 4], strides = [1, 1, 1]} : vector<3x3x4xf32> to vector<1x1x4xf32>
    %33 = vector.shape_cast %32 : vector<1x1x4xf32> to vector<4xf32>
    %34 = vector.shape_cast %33 : vector<4xf32> to vector<1x1x4xf32>
    %35 = vector.broadcast %34 : vector<1x1x4xf32> to vector<8x16x4xf32>
    %36 = arith.mulf %31, %35 : vector<8x16x4xf32>
    %37 = arith.addf %30, %36 : vector<8x16x4xf32>
    %38 = vector.extract_strided_slice %15 {offsets = [1, 0, 0], sizes = [8, 16, 4], strides = [1, 1, 1]} : vector<10x16x4xf32> to vector<8x16x4xf32>
    %39 = vector.extract_strided_slice %14 {offsets = [1, 0, 0], sizes = [1, 1, 4], strides = [1, 1, 1]} : vector<3x3x4xf32> to vector<1x1x4xf32>
    %40 = vector.shape_cast %39 : vector<1x1x4xf32> to vector<4xf32>
    %41 = vector.shape_cast %40 : vector<4xf32> to vector<1x1x4xf32>
    %42 = vector.broadcast %41 : vector<1x1x4xf32> to vector<8x16x4xf32>
    %43 = arith.mulf %38, %42 : vector<8x16x4xf32>
    %44 = arith.addf %37, %43 : vector<8x16x4xf32>
    %45 = vector.extract_strided_slice %16 {offsets = [1, 0, 0], sizes = [8, 16, 4], strides = [1, 1, 1]} : vector<10x16x4xf32> to vector<8x16x4xf32>
    %46 = vector.extract_strided_slice %14 {offsets = [1, 1, 0], sizes = [1, 1, 4], strides = [1, 1, 1]} : vector<3x3x4xf32> to vector<1x1x4xf32>
    %47 = vector.shape_cast %46 : vector<1x1x4xf32> to vector<4xf32>
    %48 = vector.shape_cast %47 : vector<4xf32> to vector<1x1x4xf32>
    %49 = vector.broadcast %48 : vector<1x1x4xf32> to vector<8x16x4xf32>
    %50 = arith.mulf %45, %49 : vector<8x16x4xf32>
    %51 = arith.addf %44, %50 : vector<8x16x4xf32>
    %52 = vector.extract_strided_slice %17 {offsets = [1, 0, 0], sizes = [8, 16, 4], strides = [1, 1, 1]} : vector<10x16x4xf32> to vector<8x16x4xf32>
    %53 = vector.extract_strided_slice %14 {offsets = [1, 2, 0], sizes = [1, 1, 4], strides = [1, 1, 1]} : vector<3x3x4xf32> to vector<1x1x4xf32>
    %54 = vector.shape_cast %53 : vector<1x1x4xf32> to vector<4xf32>
    %55 = vector.shape_cast %54 : vector<4xf32> to vector<1x1x4xf32>
    %56 = vector.broadcast %55 : vector<1x1x4xf32> to vector<8x16x4xf32>
    %57 = arith.mulf %52, %56 : vector<8x16x4xf32>
    %58 = arith.addf %51, %57 : vector<8x16x4xf32>
    %59 = vector.extract_strided_slice %15 {offsets = [2, 0, 0], sizes = [8, 16, 4], strides = [1, 1, 1]} : vector<10x16x4xf32> to vector<8x16x4xf32>
    %60 = vector.extract_strided_slice %14 {offsets = [2, 0, 0], sizes = [1, 1, 4], strides = [1, 1, 1]} : vector<3x3x4xf32> to vector<1x1x4xf32>
    %61 = vector.shape_cast %60 : vector<1x1x4xf32> to vector<4xf32>
    %62 = vector.shape_cast %61 : vector<4xf32> to vector<1x1x4xf32>
    %63 = vector.broadcast %62 : vector<1x1x4xf32> to vector<8x16x4xf32>
    %64 = arith.mulf %59, %63 : vector<8x16x4xf32>
    %65 = arith.addf %58, %64 : vector<8x16x4xf32>
    %66 = vector.extract_strided_slice %16 {offsets = [2, 0, 0], sizes = [8, 16, 4], strides = [1, 1, 1]} : vector<10x16x4xf32> to vector<8x16x4xf32>
    %67 = vector.extract_strided_slice %14 {offsets = [2, 1, 0], sizes = [1, 1, 4], strides = [1, 1, 1]} : vector<3x3x4xf32> to vector<1x1x4xf32>
    %68 = vector.shape_cast %67 : vector<1x1x4xf32> to vector<4xf32>
    %69 = vector.shape_cast %68 : vector<4xf32> to vector<1x1x4xf32>
    %70 = vector.broadcast %69 : vector<1x1x4xf32> to vector<8x16x4xf32>
    %71 = arith.mulf %66, %70 : vector<8x16x4xf32>
    %72 = arith.addf %65, %71 : vector<8x16x4xf32>
    %73 = vector.extract_strided_slice %17 {offsets = [2, 0, 0], sizes = [8, 16, 4], strides = [1, 1, 1]} : vector<10x16x4xf32> to vector<8x16x4xf32>
    %74 = vector.extract_strided_slice %14 {offsets = [2, 2, 0], sizes = [1, 1, 4], strides = [1, 1, 1]} : vector<3x3x4xf32> to vector<1x1x4xf32>
    %75 = vector.shape_cast %74 : vector<1x1x4xf32> to vector<4xf32>
    %76 = vector.shape_cast %75 : vector<4xf32> to vector<1x1x4xf32>
    %77 = vector.broadcast %76 : vector<1x1x4xf32> to vector<8x16x4xf32>
    %78 = arith.mulf %73, %77 : vector<8x16x4xf32>
    %79 = arith.addf %72, %78 : vector<8x16x4xf32>
    %80 = vector.shape_cast %79 : vector<8x16x4xf32> to vector<128x4xf32>
    %c0_24 = arith.constant 0 : index
    %c0_25 = arith.constant 0 : index
    %81 = vector.load %arg6[%c0_24, %c0_25] : memref<8x4xf32, #tpu.memory_space<vmem>>, vector<8x4xf32>
    %cst = arith.constant dense<0.000000e+00> : vector<8x128xf32>
    %82 = tpu.matmul %81, %80, %cst {dimension_numbers = #tpu.dot_dimension_numbers<[1], [1], [0], [0], [0, 0, 1, 0], [], []>} : vector<8x4xf32>, vector<128x4xf32>, vector<8x128xf32> -> vector<8x128xf32>
    %c0_26 = arith.constant 0 : index
    %c0_27 = arith.constant 0 : index
    %83 = vector.load %arg7[%c0_26, %c0_27] : memref<8x1xf32, #tpu.memory_space<vmem>>, vector<8x1xf32>
    %84 = vector.broadcast %83 : vector<8x1xf32> to vector<8x128xf32>
    %85 = arith.addf %82, %84 : vector<8x128xf32>
    %c0_28 = arith.constant 0 : index
    %c0_29 = arith.constant 0 : index
    %c0_30 = arith.constant 0 : index
    %86 = vector.load %arg8[%c0_28, %c0_29, %c0_30] : memref<1x8x128xf32, #tpu.memory_space<vmem>>, vector<1x8x128xf32>
    %87 = vector.shape_cast %86 : vector<1x8x128xf32> to vector<8x128xf32>
    %88 = vector.shape_cast %85 : vector<8x128xf32> to vector<1x8x128xf32>
    tpu.vector_store %arg8[%c0_28, %c0_29, %c0_30], %88 {strides = array<i32>} : memref<1x8x128xf32, #tpu.memory_space<vmem>>, vector<1x8x128xf32>,
    return
  }
  func.func @transform_0(%arg0: i32, %arg1: i32) -> (i32, i32, i32, i32) {
    %c0_i32 = arith.constant 0 : i32
    %c0_i32_0 = arith.constant 0 : i32
    %c0_i32_1 = arith.constant 0 : i32
    return %arg0, %arg1, %c0_i32, %c0_i32_0 : i32, i32, i32, i32
  }
  func.func @transform_1(%arg0: i32, %arg1: i32) -> (i32, i32, i32, i32) {
    %c1_i32 = arith.constant 1 : i32
    %0 = arith.addi %arg1, %c1_i32 : i32
    %c8_i32 = arith.constant 8 : i32
    %1 = arith.muli %0, %c8_i32 : i32
    %c0_i32 = arith.constant 0 : i32
    %c0_i32_0 = arith.constant 0 : i32
    %c0_i32_1 = arith.constant 0 : i32
    return %arg0, %1, %c0_i32, %c0_i32_0 : i32, i32, i32, i32
  }
  func.func @transform_2(%arg0: i32, %arg1: i32) -> (i32, i32, i32, i32) {
    %c1_i32 = arith.constant 1 : i32
    %0 = arith.addi %arg1, %c1_i32 : i32
    %c8_i32 = arith.constant 8 : i32
    %1 = arith.muli %0, %c8_i32 : i32
    %c1_i32_0 = arith.constant 1 : i32
    %2 = arith.addi %1, %c1_i32_0 : i32
    %c0_i32 = arith.constant 0 : i32
    %c0_i32_1 = arith.constant 0 : i32
    %c0_i32_2 = arith.constant 0 : i32
    return %arg0, %2, %c0_i32, %c0_i32_1 : i32, i32, i32, i32
  }
  func.func @transform_3(%arg0: i32, %arg1: i32) -> (i32, i32, i32) {
    %c0_i32 = arith.constant 0 : i32
    %c0_i32_0 = arith.constant 0 : i32
    %c0_i32_1 = arith.constant 0 : i32
    %c0_i32_2 = arith.constant 0 : i32
    return %c0_i32, %c0_i32_0, %c0_i32_1 : i32, i32, i32
  }
  func.func @transform_4(%arg0: i32, %arg1: i32) -> (i32, i32) {
    %c0_i32 = arith.constant 0 : i32
    %c0_i32_0 = arith.constant 0 : i32
    %c0_i32_1 = arith.constant 0 : i32
    return %c0_i32, %c0_i32_0 : i32, i32
  }
  func.func @transform_5(%arg0: i32, %arg1: i32) -> (i32, i32) {
    %c0_i32 = arith.constant 0 : i32
    %c0_i32_0 = arith.constant 0 : i32
    %c0_i32_1 = arith.constant 0 : i32
    return %c0_i32, %c0_i32_0 : i32, i32
  }
  func.func @transform_6(%arg0: i32, %arg1: i32) -> (i32, i32, i32) {
    %c0_i32 = arith.constant 0 : i32
    %c0_i32_0 = arith.constant 0 : i32
    return %arg0, %c0_i32, %arg1 : i32, i32, i32
  }
}

</mosaic_0001>

<bundles_post_ra>
// kernel: tpu_custom_call.1
= control target key start
LH: loop header
LB: loop body
LE: loop exit
PB: predicated region body
PF: predicated region fallthrough
CT: control target
= control target key end

     0   :  { %11 = vsyncpa [#allocation4], 0  ;;  %s2832_s0 = inlined_call_operand.vmem [shape: f32[2,18,18,4], index: 0, kind: input, shape index: {}]   ;;  %s2833_s1 = inlined_call_operand.vmem [shape: f32[2,18,18,4], index: 1, kind: input, shape index: {}]   ;;  %s2834_s2 = inlined_call_operand.vmem [shape: f32[2,18,18,4], index: 2, kind: input, shape index: {}]   ;;  %s2835_s3 = inlined_call_operand.vmem [shape: f32[3,3,4], index: 3, kind: input, shape index: {}]   ;;  %s2836_s4 = inlined_call_operand.vmem [shape: f32[8,4], index: 4, kind: input, shape index: {}]   ;;  %s2837_s5 = inlined_call_operand.vmem [shape: f32[8,1], index: 5, kind: input, shape index: {}]   ;;  %s2838_s6 = inlined_call_operand.hbm [shape: f32[2,8,256], index: 6, kind: output, shape index: {}]  }
   0x1   :  { %13 = vsyncpa [#allocation4 + $0x1], 0  ;;  %s1928_s21 = smov 0   ;;  %s1930_s22 = smov 0  }
   0x2   :  { %s1932_s23 = smov 0   ;;  %s1934_s24 = smov 0  }
   0x3   :  { %s1936_s25 = smov 0   ;;  %s1938_s26 = smov 0  }
   0x4   :  { %s1940_s27 = smov 0   ;;  %s1942_s28 = smov 0  }
   0x5 LB: > { %s1614_s29 = sadd.s32 4294967295, %s1887_s28   ;;  %s1615_s30 = sadd.s32 4294967294, %s1887_s28   ;;  %s1887_s28 = sphi %s1942_s28, %s19_s28   ;;  %s1883_s27 = sphi %s1940_s27, %s2854_s27   ;;  %s1879_s26 = sphi %s1938_s26, %s2853_s26   ;;  %s1875_s25 = sphi %s1936_s25, %s2852_s25   ;;  %s1871_s24 = sphi %s1934_s24, %s2851_s24   ;;  %s1867_s23 = sphi %s1932_s23, %s2850_s23   ;;  %s1863_s22 = sphi %s1930_s22, %s2849_s22   ;;  %s1859_s21 = sphi %s1928_s21, %s2848_s21  }
   0x6   : > { %s28_s7 = sadd.s32 1, %s1879_s26  ;;  %s31_s8 = sadd.s32 1, %s1883_s27 }
   0x7   : > { %p29_p0 = scmp.ge.s32.totalorder %s28_s7, 2  ;;  %p207_p1 = scmp.ne.s32.totalorder %s1867_s23, %s1863_s22 }
   0x8   : > { %p208_p2 = scmp.eq.s32.totalorder %s1614_s29, 3  ;;  %p213_p5 = scmp.ne.s32.totalorder %s1863_s22, %s1859_s21 }
   0x9   : > { %s2856_s7 = smov (%p29_p0, %s28_s7), 0  ;;  %s2858_s8 = smov (!%p29_p0, %s31_s8), %s1883_s27 }
   0xa   : > { %2841 = sst [smem:[#allocation6_spill]] %s2856_s7  ;;  %s193_s9 = ssub.s32 %s1879_s26, %s2856_s7 }
   0xb   : > { %p1979_p3 = por %p208_p2, %p207_p1  ;;  %p33_p4 = scmp.ge.s32.totalorder %s2858_s8, 2 }
   0xc   : > { %p214_p6 = scmp.eq.s32.totalorder %s1615_s30, 3  ;;  %p1622_p7 = scmp.ge.s32.totalorder %s1887_s28, 1 }
   0xd   : > { %s2860_s8 = smov (%p33_p4, %s2858_s8), 0  ;;  %p299_p9 = scmp.lt.s32.totalorder %s1887_s28, 5 }
   0xe   : > { %2843 = sst [smem:[#allocation7_spill]] %s2860_s8  ;;  %p1988_p8 = por %p214_p6, %p213_p5 }
   0xf   : > { %s192_s12 = ssub.s32 %s1883_s27, %s2860_s8  ;;  %s197_s13 = sadd.s32 1, %s1867_s23 }
  0x10   : > { %s194_s14 = sor.u32 %s193_s9, %s192_s12  ;;  %p300_p10 = pnand %p1622_p7, %p299_p9 }
  0x11   : > { %p195_p11 = scmp.eq.s32.totalorder %s194_s14, 0  ;;  %s1624_s16 = sshll.u32 (!%p300_p10), %s1871_s24, 3 }
  0x12   : > { %303 = sbr.rel (%p300_p10) target bundleno = 405 (0x195), region = 44  ;;  %p368_p12 = scmp.lt.s32.totalorder (!%p300_p10), %s1875_s25, 1 }
  0x13   : > { %s1997_s15 = scalar_select %p195_p11, %s1867_s23, %s197_s13  }
  0x14   : > { %p370_p13 = scmp.lt.s32.totalorder (!%p300_p10), %s1624_s16, 17  ;;  %s2002_s17 = sadd.s32 (!%p300_p10), 8, %s1624_s16 }
  0x15   : > { %p387_p0 = scmp.lt.s32.totalorder (!%p300_p10), %s2002_s17, 17  ;;  %s398_s29 = sadd.s32 (!%p300_p10), 1, %s2002_s17 }
  0x16   : > { %p2018_p1 = scmp.lt.s32.totalorder (!%p300_p10), %s398_s29, 17 }
  0x17   : > { %v1889_v0 = vmov 0.0   ;;  %s369_s18 = scalar_select %p368_p12, %s1875_s25, 1  ;;  %v508_v1 = vlaneseq  ;;  %vm435_vm0 = vcmask 31744   ;;  %vm438_vm1 = vcmask 25600   ;;  %v505_v5 = vld [vmem:[%s2835_s3] sm:$0x7] }
  0x18   : > { %1681 = vmatprep.subr.mxu0 %v1889_v0  ;;  %s2862_s16 = smov (!%p370_p13, %s1624_s16), 17  ;;  %v506_v13 = vld [vmem:[%s2835_s3 + $0x4] sm:$0x7]  ;;  %s2864_s29 = smov (!%p2018_p1, %s398_s29), 17  ;;  %v507_v20 = vld [vmem:[%s2835_s3 + $0x8] sm:$0x7] }
  0x19   : > { %s2005_s19 = smul.u32 54, %s369_s18  ;;  %v509_v2 = vshrl.u32 %v508_v1, 7  ;;  %vm580_vm2 = vcmask 1046528   ;;  %vm705_vm3 = vcmask 1045504   ;;  %vm1890_vm4 = vmmov 0  }
  0x1a   : > { %s1716_s20 = smul.u32 3, %s2862_s16  ;;  %1713 = vmatprep.mubr.msk.f32.mxu0 %vm1890_vm4, %v1889_v0 }
  0x1b   : > { %s388_s30 = scalar_select %p387_p0, %s2002_s17, 17  ;;  %v2028_v6 = vsub.s32 0, %v509_v2  ;;  %v2030_v7 = vsub.s32 1, %v509_v2  ;;  %v655_v9 = vsub.s32 2, %v509_v2 }
  0x1c   : > { %s374_s9 = sadd.s32 %s2005_s19, %s1716_s20  ;;  %s1719_s17 = smul.u32 3, %s2864_s29 }
  0x1d   : > { %s1625_s12 = sshll.u32 %s374_s9, 3  ;;  %s1718_s13 = smul.u32 3, %s388_s30  ;;  %v2071_v24 = vrot.slane %v505_v5, %v2028_v6  ;;  %v2074_v25 = vrot.slane %v505_v5, %v2030_v7  ;;  %v2076_v26 = vrot.slane %v505_v5, %v655_v9  ;;  %v2092_v33 = vrot.slane %v506_v13, %v2028_v6 }
  0x1e   : > { %s2014_s7 = scalar_lea.vmem %s2832_s0, %s1625_s12  ;;  %s405_s29 = sadd.s32 %s1719_s17, %s2005_s19  ;;  %v2095_v34 = vrot.slane %v506_v13, %v2030_v7  ;;  %v2107_v40 = vrot.slane %v506_v13, %v655_v9  ;;  %v2110_v41 = vrot.slane %v507_v20, %v2028_v6  ;;  %v2113_v42 = vrot.slane %v507_v20, %v2030_v7 }
  0x1f   : > { %s391_s18 = sadd.s32 %s1718_s13, %s2005_s19  ;;  %v433_v3 = vld [vmem:[%s2014_s7 + $0xb0] sm:$0xff]  ;;  %v434_v4 = vld [vmem:[%s2014_s7 + $0xb8] sm:$0x3]  ;;  %v432_v8 = vld [vmem:[%s2014_s7 + $0xa8] sm:$0xff]  ;;  %s1629_s16 = sshll.u32 %s405_s29, 3  ;;  %v2115_v43 = vrot.slane %v507_v20, %v655_v9 }
  0x20   : > { %s1627_s8 = sshll.u32 %s391_s18, 3  ;;  %459 = vst.msk [vmem:[#allocation2 + $0xb0] sm:$0xff] %vm435_vm0, %v433_v3  ;;  %458 = vst.msk [vmem:[#allocation2 + $0xa8] sm:$0xff] %vm435_vm0, %v432_v8  ;;  %v430_v10 = vld [vmem:[%s2014_s7 + $0x98] sm:$0xff]  ;;  %v431_v11 = vld [vmem:[%s2014_s7 + $0xa0] sm:$0x3]  ;;  %s407_s9 = scalar_lea.vmem %s2834_s2, %s1629_s16 }
  0x21   : > { %460 = vst.msk [vmem:[#allocation2 + $0xb8] sm:$0x3] %vm438_vm1, %v434_v4  ;;  %v429_v12 = vld [vmem:[%s2014_s7 + $0x90] sm:$0xff]  ;;  %s393_s13 = scalar_lea.vmem %s2833_s1, %s1627_s8  ;;  %457 = vst.msk [vmem:[#allocation2 + $0xa0] sm:$0x3] %vm438_vm1, %v431_v11  ;;  %v427_v14 = vld [vmem:[%s2014_s7 + $0x80] sm:$0xff] }
  0x22   : > { %456 = vst.msk [vmem:[#allocation2 + $0x98] sm:$0xff] %vm435_vm0, %v430_v10  ;;  %455 = vst.msk [vmem:[#allocation2 + $0x90] sm:$0xff] %vm435_vm0, %v429_v12  ;;  %v428_v15 = vld [vmem:[%s2014_s7 + $0x88] sm:$0x3]  ;;  %v426_v16 = vld [vmem:[%s2014_s7 + $0x78] sm:$0xff]  ;;  %s359_s20 = sand.u32 1, %s1863_s22  }
  0x23   : > { %v461_v17 = vld [vmem:[%s393_s13] sm:$0xff]  ;;  %v462_v18 = vld [vmem:[%s393_s13 + $0x8] sm:$0xff]  ;;  %v463_v19 = vld [vmem:[%s393_s13 + $0x10] sm:$0x3]  ;;  %453 = vst.msk [vmem:[#allocation2 + $0x80] sm:$0xff] %vm435_vm0, %v427_v14  ;;  %s1623_s18 = sshll.u32 %s359_s20, 3 }
  0x24   : > { %454 = vst.msk [vmem:[#allocation2 + $0x88] sm:$0x3] %vm438_vm1, %v428_v15  ;;  %467 = vst.msk [vmem:[#allocation2 + $0xd0] sm:$0x3] %vm438_vm1, %v463_v19  ;;  %v424_v21 = vld [vmem:[%s2014_s7 + $0x68] sm:$0xff]  ;;  %v423_v23 = vld [vmem:[%s2014_s7 + $0x60] sm:$0xff] }
  0x25   : > { %452 = vst.msk [vmem:[#allocation2 + $0x78] sm:$0xff] %vm435_vm0, %v426_v16  ;;  %465 = vst.msk [vmem:[#allocation2 + $0xc0] sm:$0xff] %vm435_vm0, %v461_v17  ;;  %v425_v22 = vld [vmem:[%s2014_s7 + $0x70] sm:$0x3]  ;;  %v422_v28 = vld [vmem:[%s2014_s7 + $0x58] sm:$0x3] }
  0x26   : > { %466 = vst.msk [vmem:[#allocation2 + $0xc8] sm:$0xff] %vm435_vm0, %v462_v18  ;;  %450 = vst.msk [vmem:[#allocation2 + $0x68] sm:$0xff] %vm435_vm0, %v424_v21  ;;  %v421_v27 = vld [vmem:[%s2014_s7 + $0x50] sm:$0xff]  ;;  %v420_v29 = vld [vmem:[%s2014_s7 + $0x48] sm:$0xff]  ;;  %s1648_s30 = sshll.u32 %s1875_s25, 1  ;;  %s361_s16 = scalar_lea.vmem [#allocation3], %s1623_s18 }
  0x27   : > { %451 = vst.msk [vmem:[#allocation2 + $0x70] sm:$0x3] %vm438_vm1, %v425_v22  ;;  %448 = vst.msk [vmem:[#allocation2 + $0x58] sm:$0x3] %vm438_vm1, %v422_v28  ;;  %v418_v30 = vld [vmem:[%s2014_s7 + $0x38] sm:$0xff]  ;;  %v417_v32 = vld [vmem:[%s2014_s7 + $0x30] sm:$0xff]  ;;  %s1487_s17 = sadd.s32 %s1871_s24, %s1648_s30 }
  0x28   : > { %449 = vst.msk [vmem:[#allocation2 + $0x60] sm:$0xff] %vm435_vm0, %v423_v23  ;;  %447 = vst.msk [vmem:[#allocation2 + $0x50] sm:$0xff] %vm435_vm0, %v421_v27  ;;  %v419_v31 = vld [vmem:[%s2014_s7 + $0x40] sm:$0x3]  ;;  %v416_v36 = vld [vmem:[%s2014_s7 + $0x28] sm:$0x3] }
  0x29   : > { %446 = vst.msk [vmem:[#allocation2 + $0x48] sm:$0xff] %vm435_vm0, %v420_v29  ;;  %444 = vst.msk [vmem:[#allocation2 + $0x38] sm:$0xff] %vm435_vm0, %v418_v30  ;;  %v415_v35 = vld [vmem:[%s2014_s7 + $0x20] sm:$0xff]  ;;  %v414_v37 = vld [vmem:[%s2014_s7 + $0x18] sm:$0xff]  ;;  %s1649_s29 = sshll.u32 %s1487_s17, 7  ;;  %s1491_s19 = sshll.u32 %s361_s16, 4  ;;  %s1492_s19 = int_to_ptr.vmem [resolvable:$true] %s1491_s19 }
  0x2a   : > { %445 = vst.msk [vmem:[#allocation2 + $0x40] sm:$0x3] %vm438_vm1, %v419_v31  ;;  %v2103_v38 = vld [vmem:[#allocation2 + $0xb0] sm:$0xff]  ;;  %v2105_v39 = vld [vmem:[#allocation2 + $0xb8] sm:$0x3]  ;;  %v2117_v44 = vld [vmem:[#allocation2 + $0xa8] sm:$0xff] }
  0x2b   : > { %443 = vst.msk [vmem:[#allocation2 + $0x30] sm:$0xff] %vm435_vm0, %v417_v32  ;;  %441 = vst.msk [vmem:[#allocation2 + $0x20] sm:$0xff] %vm435_vm0, %v415_v35  ;;  %v527_v45 = vmul.f32 %v2071_v24, %v2103_v38  ;;  %v554_v46 = vmul.f32 %v2074_v25, %v2103_v38  ;;  %v555_v47 = vmul.f32 %v2074_v25, %v2105_v39  ;;  %v2133_v49 = vld [vmem:[#allocation2 + $0x98] sm:$0xff]  ;;  %v468_v50 = vld [vmem:[%s407_s9] sm:$0xff]  ;;  %s1476_s12 = scalar_lea.sflag [#allocation4], %s359_s20  ;;  %s1795_s13 = scalar_lea.vmem %s1492_s19, 128 }
  0x2c   : > { %442 = vst.msk [vmem:[#allocation2 + $0x28] sm:$0x3] %vm438_vm1, %v416_v36  ;;  %v679_v48 = vmul.f32 %v2076_v26, %v2103_v38  ;;  %v469_v51 = vld [vmem:[%s407_s9 + $0x8] sm:$0xff]  ;;  %v470_v52 = vld [vmem:[%s407_s9 + $0x10] sm:$0x3]  ;;  %v680_v53 = vmul.f32 %v2076_v26, %v2105_v39  ;;  %v526_v54 = vmul.f32 %v2071_v24, %v2117_v44  ;;  %v553_v55 = vmul.f32 %v2074_v25, %v2117_v44  ;;  %v2165_v7 = vld [vmem:[#allocation2 + $0xc0] sm:$0xff]  ;;  %p1796_p2 = scmp.ne.s32.totalorder %s1492_s19, %s1795_s13 }
  0x2d   : > { %440 = vst.msk [vmem:[#allocation2 + $0x18] sm:$0xff] %vm435_vm0, %v414_v37  ;;  %v678_v56 = vmul.f32 %v2076_v26, %v2117_v44  ;;  %473 = vst.msk [vmem:[#allocation2 + $0xe0] sm:$0xff] %vm435_vm0, %v469_v51  ;;  %v2145_v57 = vld [vmem:[#allocation2 + $0xc8] sm:$0xff]  ;;  %v2147_v58 = vld [vmem:[#allocation2 + $0xd0] sm:$0x3]  ;;  %v617_v59 = vrot.slane %v554_v46, 1  ;;  %v2152_v62 = vmul.f32 %v2071_v24, %v2133_v49  ;;  %v796_v21 = vmul.f32 %v2092_v33, %v2165_v7 }
  0x2e   : > { %474 = vst.msk [vmem:[#allocation2 + $0xe8] sm:$0x3] %vm438_vm1, %v470_v52  ;;  %v619_v60 = vrot.slane %v555_v47, 1  ;;  %v742_v61 = vrot.slane %v679_v48, 2  ;;  %v744_v63 = vrot.slane %v680_v53, 2  ;;  %v797_v1 = vmul.f32 %v2092_v33, %v2145_v57  ;;  %v412_v29 = vld [vmem:[%s2014_s7 + $0x8] sm:$0xff]  ;;  %p1797_p4 = pnand %p1796_p2, %p1979_p3 }
  0x2f   : > { %472 = vst.msk [vmem:[#allocation2 + $0xd8] sm:$0xff] %vm435_vm0, %v468_v50  ;;  %v840_v2 = vmul.f32 %v2095_v34, %v2145_v57  ;;  %v841_v3 = vmul.f32 %v2095_v34, %v2147_v58  ;;  %v964_v5 = vmul.f32 %v2107_v40, %v2145_v57  ;;  %v965_v6 = vmul.f32 %v2107_v40, %v2147_v58  ;;  %v2169_v17 = vld [vmem:[#allocation2 + $0xa0] sm:$0x3]  ;;  %v413_v30 = vld [vmem:[%s2014_s7 + $0x10] sm:$0x3]  ;;  %s1892_s24 = smov [#allocation3]  }
  0x30   : > { %v620_v4 = vsel %vm580_vm2, %v617_v59, %v619_v60  ;;  %v616_v8 = vrot.slane %v553_v55, 1  ;;  %v745_v10 = vsel %vm705_vm3, %v742_v61, %v744_v63  ;;  %v741_v16 = vrot.slane %v678_v56, 2  ;;  %437 = vst.msk [vmem:[#allocation2 + $0x8] sm:$0xff] %vm435_vm0, %v412_v29  ;;  %v411_v52 = vld [vmem:[%s2014_s7] sm:$0xff]  ;;  %s2786_s7 = scalar_lea.hbm %s2838_s6, %s1649_s29  ;;  %p1798_p5 = pneg %p1797_p4 }
  0x31   : > { %v652_v9 = vadd.f32 %v620_v4, %v527_v45  ;;  %v902_v11 = vrot.slane %v840_v2, 1  ;;  %v904_v12 = vrot.slane %v841_v3, 1  ;;  %v1026_v13 = vrot.slane %v964_v5, 2  ;;  %439 = vst.msk [vmem:[#allocation2 + $0x10] sm:$0x3] %vm438_vm1, %v413_v30  ;;  %s1799_s25 = sshll.u32 %s1892_s24, 4  ;;  %s1800_s25 = int_to_ptr.vmem [resolvable:$false] %s1799_s25 }
  0x32   : > { %v1028_v14 = vrot.slane %v965_v6, 2  ;;  %v618_v15 = vsel %vm580_vm2, %v616_v8, %v617_v59  ;;  %v743_v23 = vsel %vm705_vm3, %v741_v16, %v742_v61  ;;  %v839_v27 = vmul.f32 %v2095_v34, %v2165_v7  ;;  %436 = vst.msk [vmem:[#allocation2] sm:$0xff] %vm435_vm0, %v411_v52  ;;  %s1801_s14 = scalar_lea.vmem %s1800_s25, 256  ;;  %p1802_p6 = scmp.lt.s32.totalorder %s1492_s19, %s1800_s25 }
  0x33   : > { %v777_v18 = vadd.f32 %v745_v10, %v652_v9  ;;  %v905_v19 = vsel %vm580_vm2, %v902_v11, %v904_v12  ;;  %v651_v20 = vadd.f32 %v618_v15, %v526_v54  ;;  %v963_v28 = vmul.f32 %v2107_v40, %v2165_v7  ;;  %p1803_p7 = scmp.lt.s32.totalorder %s1801_s14, %s1795_s13 }
  0x34   : > { %v1029_v22 = vsel %vm705_vm3, %v1026_v13, %v1028_v14  ;;  %v503_v31 = vld [vmem:[#allocation2 + $0xe0] sm:$0xff]  ;;  %v2184_v37 = vmul.f32 %v2074_v25, %v2133_v49  ;;  %v552_v45 = vmul.f32 %v2074_v25, %v2169_v17  ;;  %v901_v56 = vrot.slane %v839_v27, 1 }
  0x35   : > { %v504_v32 = vld [vmem:[#allocation2 + $0xe8] sm:$0x3]  ;;  %v813_v35 = vadd.f32 %v797_v1, %v777_v18  ;;  %v776_v36 = vadd.f32 %v743_v23, %v651_v20  ;;  %v1081_v46 = vmul.f32 %v2110_v41, %v503_v31  ;;  %v1124_v47 = vmul.f32 %v2113_v42, %v503_v31  ;;  %p1804_p9 = por %p1803_p7, %p1802_p6 }
  0x36   : > { %v1125_v48 = vmul.f32 %v2113_v42, %v504_v32  ;;  %v1248_v50 = vmul.f32 %v2115_v43, %v503_v31  ;;  %v502_v51 = vld [vmem:[#allocation2 + $0xd8] sm:$0xff]  ;;  %v1249_v54 = vmul.f32 %v2115_v43, %v504_v32  ;;  %v1025_v63 = vrot.slane %v963_v28, 2 }
  0x37   : > { %v937_v53 = vadd.f32 %v905_v19, %v813_v35  ;;  %v812_v55 = vadd.f32 %v796_v21, %v776_v36  ;;  %v1186_v59 = vrot.slane %v1124_v47, 1  ;;  %v903_v3 = vsel %vm580_vm2, %v901_v56, %v902_v11  ;;  %p1805_p10 = pnand %p1804_p9, %p1798_p5 }
  0x38   : > { %v1188_v60 = vrot.slane %v1125_v48, 1  ;;  %v1310_v61 = vrot.slane %v1248_v50, 2  ;;  %v1312_v2 = vrot.slane %v1249_v54, 2  ;;  %v1080_v4 = vmul.f32 %v2110_v41, %v502_v51  ;;  %v2228_v54 = vld [vmem:[#allocation2 + $0x90] sm:$0xff] }
  0x39   : > { %v1061_v1 = vadd.f32 %v1029_v22, %v937_v53  ;;  %v936_v6 = vadd.f32 %v903_v3, %v812_v55  ;;  %v1027_v8 = vsel %vm705_vm3, %v1025_v63, %v1026_v13  ;;  %v1123_v9 = vmul.f32 %v2113_v42, %v502_v51 }
  0x3a   : > { %v1189_v5 = vsel %vm580_vm2, %v1186_v59, %v1188_v60  ;;  %v1313_v12 = vsel %vm705_vm3, %v1310_v61, %v1312_v2  ;;  %v1247_v14 = vmul.f32 %v2115_v43, %v502_v51  ;;  %v612_v15 = vrot.slane %v2184_v37, 1 }
  0x3b   : > { %v1097_v10 = vadd.f32 %v1081_v46, %v1061_v1  ;;  %v1060_v16 = vadd.f32 %v1027_v8, %v936_v6  ;;  %v1185_v18 = vrot.slane %v1123_v9, 1  ;;  %v614_v19 = vrot.slane %v552_v45, 1 }
  0x3c   : > { %v676_v11 = vmul.f32 %v2076_v26, %v2133_v49  ;;  %v1309_v21 = vrot.slane %v1247_v14, 2  ;;  %v677_v13 = vmul.f32 %v2076_v26, %v2169_v17  ;;  %v795_v22 = vmul.f32 %v2092_v33, %v2103_v38 }
  0x3d   : > { %v1221_v20 = vadd.f32 %v1189_v5, %v1097_v10  ;;  %v1096_v23 = vadd.f32 %v1080_v4, %v1060_v16  ;;  %v1187_v27 = vsel %vm580_vm2, %v1185_v18, %v1186_v59  ;;  %v615_v28 = vsel %vm580_vm2, %v612_v15, %v614_v19 }
  0x3e   : > { %v737_v29 = vrot.slane %v676_v11, 2  ;;  %v1311_v31 = vsel %vm705_vm3, %v1309_v21, %v1310_v61  ;;  %v650_v32 = vadd.f32 %v615_v28, %v2152_v62  ;;  %v739_v35 = vrot.slane %v677_v13, 2 }
  0x3f   : > { %v1345_v30 = vadd.f32 %v1313_v12, %v1221_v20  ;;  %v1220_v36 = vadd.f32 %v1187_v27, %v1096_v23  ;;  %v837_v37 = vmul.f32 %v2095_v34, %v2103_v38  ;;  %v838_v45 = vmul.f32 %v2095_v34, %v2105_v39  ;;  %v2261_v23 = vld [vmem:[#allocation2 + $0x80] sm:$0xff] }
  0x40   : > { %v961_v46 = vmul.f32 %v2107_v40, %v2103_v38  ;;  %v740_v47 = vsel %vm705_vm3, %v737_v29, %v739_v35  ;;  %v962_v48 = vmul.f32 %v2107_v40, %v2105_v39  ;;  %v1121_v62 = vmul.f32 %v2113_v42, %v2145_v57 }
  0x41   : > { %1682 = vmatpush3.xpose.msk.msra.mxu0 %vm435_vm0, %v1345_v30  ;;  %v1344_v50 = vadd.f32 %v1311_v31, %v1220_v36  ;;  %v775_v51 = vadd.f32 %v740_v47, %v650_v32  ;;  %v897_v52 = vrot.slane %v837_v37, 1  ;;  %v899_v53 = vrot.slane %v838_v45, 1  ;;  %v2264_v32 = vld [vmem:[#allocation2 + $0x88] sm:$0x3] }
  0x42   : > { %1683 = vmatprep.subr.mxu0 %v1889_v0  ;;  %v1021_v55 = vrot.slane %v961_v46, 2  ;;  %v1023_v56 = vrot.slane %v962_v48, 2  ;;  %v1122_v59 = vmul.f32 %v2113_v42, %v2147_v58  ;;  %v1181_v60 = vrot.slane %v1121_v62, 1 }
  0x43   : > { %v811_v61 = vadd.f32 %v795_v22, %v775_v51  ;;  %v900_v63 = vsel %vm580_vm2, %v897_v52, %v899_v53  ;;  %v2235_v1 = vmul.f32 %v2115_v43, %v2145_v57  ;;  %v1246_v2 = vmul.f32 %v2115_v43, %v2147_v58 }
  0x44   : > { %v1024_v3 = vsel %vm705_vm3, %v1021_v55, %v1023_v56  ;;  %v1183_v4 = vrot.slane %v1122_v59, 1  ;;  %v550_v5 = vmul.f32 %v2074_v25, %v2228_v54  ;;  %v1079_v8 = vmul.f32 %v2110_v41, %v2145_v57 }
  0x45   : > { %1684 = vmatpush3.xpose.msk.msra.mxu0 %vm435_vm0, %v1344_v50  ;;  %v935_v6 = vadd.f32 %v900_v63, %v811_v61  ;;  %v524_v9 = vmul.f32 %v2071_v24, %v2228_v54  ;;  %v675_v58 = vmul.f32 %v2076_v26, %v2228_v54  ;;  %v1305_v10 = vrot.slane %v2235_v1, 2 }
  0x46   : > { %1685 = vmatprep.subr.mxu0 %v1889_v0  ;;  %v1307_v12 = vrot.slane %v1246_v2, 2  ;;  %v611_v14 = vrot.slane %v550_v5, 1  ;;  %v836_v16 = vmul.f32 %v2095_v34, %v2117_v44  ;;  %v1184_v19 = vsel %vm580_vm2, %v1181_v60, %v1183_v4 }
  0x47   : > { %v1059_v18 = vadd.f32 %v1024_v3, %v935_v6  ;;  %v736_v11 = vrot.slane %v675_v58, 2  ;;  %v960_v57 = vmul.f32 %v2107_v40, %v2117_v44  ;;  %v794_v21 = vmul.f32 %v2092_v33, %v2117_v44 }
  0x48   : > { %v613_v20 = vsel %vm580_vm2, %v611_v14, %v612_v15  ;;  %v896_v13 = vrot.slane %v836_v16, 1  ;;  %v1120_v22 = vmul.f32 %v2113_v42, %v2165_v7  ;;  %v1308_v35 = vsel %vm705_vm3, %v1305_v10, %v1307_v12 }
  0x49   : > { %v1095_v27 = vadd.f32 %v1079_v8, %v1059_v18  ;;  %v649_v28 = vadd.f32 %v613_v20, %v524_v9  ;;  %v738_v30 = vsel %vm705_vm3, %v736_v11, %v737_v29  ;;  %v1020_v31 = vrot.slane %v960_v57, 2 }
  0x4a   : > { %v1078_v15 = vmul.f32 %v2110_v41, %v2165_v7  ;;  %v1180_v36 = vrot.slane %v1120_v22, 1  ;;  %v1244_v37 = vmul.f32 %v2115_v43, %v2165_v7  ;;  %v898_v47 = vsel %vm580_vm2, %v896_v13, %v897_v52  ;;  %v2309_v22 = vld [vmem:[#allocation2 + $0x78] sm:$0xff] }
  0x4b   : > { %v1219_v45 = vadd.f32 %v1184_v19, %v1095_v27  ;;  %v774_v46 = vadd.f32 %v738_v30, %v649_v28  ;;  %v2274_v48 = vmul.f32 %v2074_v25, %v2261_v23  ;;  %v1022_v29 = vsel %vm705_vm3, %v1020_v31, %v1021_v55 }
  0x4c   : > { %v523_v62 = vmul.f32 %v2071_v24, %v2261_v23  ;;  %v549_v50 = vmul.f32 %v2074_v25, %v2264_v32  ;;  %v673_v51 = vmul.f32 %v2076_v26, %v2261_v23  ;;  %v674_v52 = vmul.f32 %v2076_v26, %v2264_v32 }
  0x4d   : > { %v1343_v7 = vadd.f32 %v1308_v35, %v1219_v45  ;;  %v810_v53 = vadd.f32 %v794_v21, %v774_v46  ;;  %v607_v56 = vrot.slane %v2274_v48, 1  ;;  %v1182_v59 = vsel %vm580_vm2, %v1180_v36, %v1181_v60 }
  0x4e   : > { %v1304_v61 = vrot.slane %v1244_v37, 2  ;;  %v609_v55 = vrot.slane %v549_v50, 1  ;;  %v732_v63 = vrot.slane %v673_v51, 2  ;;  %v734_v2 = vrot.slane %v674_v52, 2 }
  0x4f   : > { %1686 = vmatpush3.xpose.msk.msra.mxu0 %vm435_vm0, %v1343_v7  ;;  %v934_v1 = vadd.f32 %v898_v47, %v810_v53  ;;  %v834_v3 = vmul.f32 %v2095_v34, %v2133_v49  ;;  %v835_v4 = vmul.f32 %v2095_v34, %v2169_v17  ;;  %v793_v60 = vmul.f32 %v2092_v33, %v2133_v49 }
  0x50   : > { %1687 = vmatprep.subr.mxu0 %v1889_v0  ;;  %v610_v5 = vsel %vm580_vm2, %v607_v56, %v609_v55  ;;  %v958_v6 = vmul.f32 %v2107_v40, %v2133_v49  ;;  %v959_v8 = vmul.f32 %v2107_v40, %v2169_v17  ;;  %v735_v12 = vsel %vm705_vm3, %v732_v63, %v734_v2  ;;  %v2335_v55 = vld [vmem:[#allocation2 + $0x68] sm:$0xff] }
  0x51   : > { %v1058_v9 = vadd.f32 %v1022_v29, %v934_v1  ;;  %v648_v58 = vadd.f32 %v610_v5, %v523_v62  ;;  %v892_v14 = vrot.slane %v834_v3, 1  ;;  %v894_v16 = vrot.slane %v835_v4, 1 }
  0x52   : > { %v1016_v18 = vrot.slane %v958_v6, 2  ;;  %v1018_v19 = vrot.slane %v959_v8, 2  ;;  %v1118_v11 = vmul.f32 %v2113_v42, %v2103_v38  ;;  %v1119_v21 = vmul.f32 %v2113_v42, %v2105_v39 }
  0x53   : > { %v1094_v57 = vadd.f32 %v1078_v15, %v1058_v9  ;;  %v773_v20 = vadd.f32 %v735_v12, %v648_v58  ;;  %v2307_v13 = vmul.f32 %v2115_v43, %v2103_v38  ;;  %v1306_v27 = vsel %vm705_vm3, %v1304_v61, %v1305_v10  ;;  %v2342_v9 = vld [vmem:[#allocation2 + $0x70] sm:$0x3] }
  0x54   : > { %v895_v28 = vsel %vm580_vm2, %v892_v14, %v894_v16  ;;  %v1176_v30 = vrot.slane %v1118_v11, 1  ;;  %v1243_v31 = vmul.f32 %v2115_v43, %v2105_v39  ;;  %v1077_v36 = vmul.f32 %v2110_v41, %v2103_v38 }
  0x55   : > { %v1218_v35 = vadd.f32 %v1182_v59, %v1094_v57  ;;  %v809_v15 = vadd.f32 %v793_v60, %v773_v20  ;;  %v1178_v37 = vrot.slane %v1119_v21, 1  ;;  %v1019_v45 = vsel %vm705_vm3, %v1016_v18, %v1018_v19 }
  0x56   : > { %v1300_v46 = vrot.slane %v2307_v13, 2  ;;  %v547_v47 = vmul.f32 %v2074_v25, %v2309_v22  ;;  %v672_v10 = vmul.f32 %v2076_v26, %v2309_v22  ;;  %v1302_v62 = vrot.slane %v1243_v31, 2 }
  0x57   : > { %v1342_v48 = vadd.f32 %v1306_v27, %v1218_v35  ;;  %v933_v29 = vadd.f32 %v895_v28, %v809_v15  ;;  %v522_v39 = vmul.f32 %v2071_v24, %v2309_v22  ;;  %v1179_v50 = vsel %vm580_vm2, %v1176_v30, %v1178_v37 }
  0x58   : > { %v606_v38 = vrot.slane %v547_v47, 1  ;;  %v731_v51 = vrot.slane %v672_v10, 2  ;;  %v833_v7 = vmul.f32 %v2095_v34, %v2228_v54  ;;  %v792_v52 = vmul.f32 %v2092_v33, %v2228_v54 }
  0x59   : > { %1688 = vmatpush3.xpose.msk.msra.mxu0 %vm435_vm0, %v1342_v48  ;;  %v1057_v53 = vadd.f32 %v1019_v45, %v933_v29  ;;  %v957_v59 = vmul.f32 %v2107_v40, %v2228_v54  ;;  %v1117_v61 = vmul.f32 %v2113_v42, %v2117_v44  ;;  %v1241_v4 = vmul.f32 %v2115_v43, %v2117_v44 }
  0x5a   : > { %1689 = vmatprep.subr.mxu0 %v1889_v0  ;;  %v608_v1 = vsel %vm580_vm2, %v606_v38, %v607_v56  ;;  %v733_v2 = vsel %vm705_vm3, %v731_v51, %v732_v63  ;;  %v891_v3 = vrot.slane %v833_v7, 1  ;;  %v1303_v58 = vsel %vm705_vm3, %v1300_v46, %v1302_v62 }
  0x5b   : > { %v1093_v5 = vadd.f32 %v1077_v36, %v1057_v53  ;;  %v647_v60 = vadd.f32 %v608_v1, %v522_v39  ;;  %v1015_v6 = vrot.slane %v957_v59, 2  ;;  %v1175_v8 = vrot.slane %v1117_v61, 1 }
  0x5c   : > { %v893_v12 = vsel %vm580_vm2, %v891_v3, %v892_v14  ;;  %v1076_v16 = vmul.f32 %v2110_v41, %v2117_v44  ;;  %v2350_v56 = vmul.f32 %v2074_v25, %v2335_v55  ;;  %v1299_v11 = vrot.slane %v1241_v4, 2  ;;  %v2399_v3 = vld [vmem:[#allocation2 + $0x60] sm:$0xff] }
  0x5d   : > { %v1217_v63 = vadd.f32 %v1179_v50, %v1093_v5  ;;  %v772_v19 = vadd.f32 %v733_v2, %v647_v60  ;;  %v521_v57 = vmul.f32 %v2071_v24, %v2335_v55  ;;  %v1017_v20 = vsel %vm705_vm3, %v1015_v6, %v1016_v18 }
  0x5e   : > { %v546_v21 = vmul.f32 %v2074_v25, %v2342_v9  ;;  %v602_v14 = vrot.slane %v2350_v56, 1  ;;  %v2360_v44 = vmul.f32 %v2076_v26, %v2335_v55  ;;  %v1177_v28 = vsel %vm580_vm2, %v1175_v8, %v1176_v30 }
  0x5f   : > { %v1341_v13 = vadd.f32 %v1303_v58, %v1217_v63  ;;  %v808_v27 = vadd.f32 %v792_v52, %v772_v19  ;;  %v671_v31 = vmul.f32 %v2076_v26, %v2342_v9  ;;  %v2368_v18 = vmul.f32 %v2095_v34, %v2261_v23 }
  0x60   : > { %v604_v35 = vrot.slane %v546_v21, 1  ;;  %v727_v15 = vrot.slane %v2360_v44, 2  ;;  %v832_v36 = vmul.f32 %v2095_v34, %v2264_v32  ;;  %v2375_v30 = vmul.f32 %v2107_v40, %v2261_v23 }
  0x61   : > { %1690 = vmatpush3.xpose.msk.msra.mxu0 %vm435_vm0, %v1341_v13  ;;  %v932_v37 = vadd.f32 %v893_v12, %v808_v27  ;;  %v729_v45 = vrot.slane %v671_v31, 2  ;;  %v956_v47 = vmul.f32 %v2107_v40, %v2264_v32  ;;  %v1301_v10 = vsel %vm705_vm3, %v1299_v11, %v1300_v46 }
  0x62   : > { %1691 = vmatprep.subr.mxu0 %v1889_v0  ;;  %v605_v48 = vsel %vm580_vm2, %v602_v14, %v604_v35  ;;  %v887_v29 = vrot.slane %v2368_v18, 1  ;;  %v889_v62 = vrot.slane %v832_v36, 1  ;;  %v791_v51 = vmul.f32 %v2092_v33, %v2261_v23  ;;  %v2426_v36 = vld [vmem:[#allocation2 + $0x50] sm:$0xff] }
  0x63   : > { %v1056_v39 = vadd.f32 %v1017_v20, %v932_v37  ;;  %v646_v50 = vadd.f32 %v605_v48, %v521_v57  ;;  %v730_v38 = vsel %vm705_vm3, %v727_v15, %v729_v45  ;;  %v1011_v7 = vrot.slane %v2375_v30, 2  ;;  %v2428_v37 = vld [vmem:[#allocation2 + $0x58] sm:$0x3] }
  0x64   : > { %v1013_v53 = vrot.slane %v956_v47, 2  ;;  %v2389_v52 = vmul.f32 %v2113_v42, %v2133_v49  ;;  %v1116_v46 = vmul.f32 %v2113_v42, %v2169_v17  ;;  %v2395_v1 = vmul.f32 %v2115_v43, %v2133_v49 }
  0x65   : > { %v1092_v59 = vadd.f32 %v1076_v16, %v1056_v39  ;;  %v771_v61 = vadd.f32 %v730_v38, %v646_v50  ;;  %v1240_v2 = vmul.f32 %v2115_v43, %v2169_v17  ;;  %v890_v4 = vsel %vm580_vm2, %v887_v29, %v889_v62 }
  0x66   : > { %v1075_v5 = vmul.f32 %v2110_v41, %v2133_v49  ;;  %v1171_v60 = vrot.slane %v2389_v52, 1  ;;  %v1173_v6 = vrot.slane %v1116_v46, 1  ;;  %v1295_v12 = vrot.slane %v2395_v1, 2 }
  0x67   : > { %v1216_v8 = vadd.f32 %v1177_v28, %v1092_v59  ;;  %v807_v58 = vadd.f32 %v791_v51, %v771_v61  ;;  %v1297_v16 = vrot.slane %v1240_v2, 2  ;;  %v1014_v56 = vsel %vm705_vm3, %v1011_v7, %v1013_v53 }
  0x68   : > { %v520_v17 = vmul.f32 %v2071_v24, %v2399_v3  ;;  %v544_v63 = vmul.f32 %v2074_v25, %v2399_v3  ;;  %v669_v19 = vmul.f32 %v2076_v26, %v2399_v3  ;;  %v1174_v57 = vsel %vm580_vm2, %v1171_v60, %v1173_v6 }
  0x69   : > { %v1340_v49 = vadd.f32 %v1301_v10, %v1216_v8  ;;  %v931_v11 = vadd.f32 %v890_v4, %v807_v58  ;;  %v830_v20 = vmul.f32 %v2095_v34, %v2309_v22  ;;  %v790_v13 = vmul.f32 %v2092_v33, %v2309_v22 }
  0x6a   : > { %v601_v21 = vrot.slane %v544_v63, 1  ;;  %v726_v44 = vrot.slane %v669_v19, 2  ;;  %v954_v27 = vmul.f32 %v2107_v40, %v2309_v22  ;;  %v1298_v31 = vsel %vm705_vm3, %v1295_v12, %v1297_v16 }
  0x6b   : > { %1692 = vmatpush3.xpose.msk.msra.mxu0 %vm435_vm0, %v1340_v49  ;;  %v1055_v28 = vadd.f32 %v1014_v56, %v931_v11  ;;  %v886_v35 = vrot.slane %v830_v20, 1  ;;  %v1114_v18 = vmul.f32 %v2113_v42, %v2228_v54  ;;  %v1238_v10 = vmul.f32 %v2115_v43, %v2228_v54 }
  0x6c   : > { %1693 = vmatprep.subr.mxu0 %v1889_v0  ;;  %v603_v45 = vsel %vm580_vm2, %v601_v21, %v602_v14  ;;  %v728_v30 = vsel %vm705_vm3, %v726_v44, %v727_v15  ;;  %v1010_v47 = vrot.slane %v954_v27, 2  ;;  %v1074_v39 = vmul.f32 %v2110_v41, %v2228_v54 }
  0x6d   : > { %v1091_v48 = vadd.f32 %v1075_v5, %v1055_v28  ;;  %v645_v62 = vadd.f32 %v603_v45, %v520_v17  ;;  %v519_v50 = vmul.f32 %v2071_v24, %v2426_v36  ;;  %v888_v38 = vsel %vm580_vm2, %v886_v35, %v887_v29  ;;  %v2484_v45 = vld [vmem:[#allocation2 + $0x48] sm:$0xff] }
  0x6e   : > { %v1170_v51 = vrot.slane %v1114_v18, 1  ;;  %v2442_v14 = vmul.f32 %v2074_v25, %v2426_v36  ;;  %v543_v15 = vmul.f32 %v2074_v25, %v2428_v37  ;;  %v1012_v46 = vsel %vm705_vm3, %v1010_v47, %v1011_v7 }
  0x6f   : > { %v1215_v53 = vadd.f32 %v1174_v57, %v1091_v48  ;;  %v770_v52 = vadd.f32 %v728_v30, %v645_v62  ;;  %v2449_v54 = vmul.f32 %v2076_v26, %v2426_v36  ;;  %v1294_v59 = vrot.slane %v1238_v10, 2 }
  0x70   : > { %v597_v61 = vrot.slane %v2442_v14, 1  ;;  %v599_v29 = vrot.slane %v543_v15, 1  ;;  %v668_v2 = vmul.f32 %v2076_v26, %v2428_v37  ;;  %v789_v8 = vmul.f32 %v2092_v33, %v2335_v55 }
  0x71   : > { %v1339_v4 = vadd.f32 %v1298_v31, %v1215_v53  ;;  %v806_v5 = vadd.f32 %v790_v13, %v770_v52  ;;  %v722_v6 = vrot.slane %v2449_v54, 2  ;;  %v828_v16 = vmul.f32 %v2095_v34, %v2335_v55 }
  0x72   : > { %v600_v7 = vsel %vm580_vm2, %v597_v61, %v599_v29  ;;  %v724_v58 = vrot.slane %v668_v2, 2  ;;  %v829_v56 = vmul.f32 %v2095_v34, %v2342_v9  ;;  %v2465_v19 = vmul.f32 %v2107_v40, %v2335_v55 }
  0x73   : > { %1694 = vmatpush3.xpose.msk.msra.mxu0 %vm435_vm0, %v1339_v4  ;;  %v930_v17 = vadd.f32 %v888_v38, %v806_v5  ;;  %v644_v63 = vadd.f32 %v600_v7, %v519_v50  ;;  %v953_v49 = vmul.f32 %v2107_v40, %v2342_v9  ;;  %v1172_v11 = vsel %vm580_vm2, %v1170_v51, %v1171_v60 }
  0x74   : > { %1695 = vmatprep.subr.mxu0 %v1889_v0  ;;  %v725_v57 = vsel %vm705_vm3, %v722_v6, %v724_v58  ;;  %v882_v20 = vrot.slane %v828_v16, 1  ;;  %v884_v21 = vrot.slane %v829_v56, 1  ;;  %v1006_v27 = vrot.slane %v2465_v19, 2  ;;  %v2515_v56 = vld [vmem:[#allocation2 + $0x38] sm:$0xff] }
  0x75   : > { %v1054_v44 = vadd.f32 %v1012_v46, %v930_v17  ;;  %v769_v13 = vadd.f32 %v725_v57, %v644_v63  ;;  %v1008_v28 = vrot.slane %v953_v49, 2  ;;  %v2476_v35 = vmul.f32 %v2113_v42, %v2261_v23  ;;  %v2517_v17 = vld [vmem:[#allocation2 + $0x40] sm:$0x3] }
  0x76   : > { %v885_v31 = vsel %vm580_vm2, %v882_v20, %v884_v21  ;;  %v1113_v18 = vmul.f32 %v2113_v42, %v2264_v32  ;;  %v2482_v60 = vmul.f32 %v2115_v43, %v2261_v23  ;;  %v1296_v47 = vsel %vm705_vm3, %v1294_v59, %v1295_v12 }
  0x77   : > { %v1090_v30 = vadd.f32 %v1074_v39, %v1054_v44  ;;  %v805_v10 = vadd.f32 %v789_v8, %v769_v13  ;;  %v1237_v48 = vmul.f32 %v2115_v43, %v2264_v32  ;;  %v1009_v62 = vsel %vm705_vm3, %v1006_v27, %v1008_v28 }
  0x78   : > { %v1073_v50 = vmul.f32 %v2110_v41, %v2261_v23  ;;  %v1166_v38 = vrot.slane %v2476_v35, 1  ;;  %v1168_v51 = vrot.slane %v1113_v18, 1  ;;  %v1290_v39 = vrot.slane %v2482_v60, 2 }
  0x79   : > { %v1214_v14 = vadd.f32 %v1172_v11, %v1090_v30  ;;  %v929_v15 = vadd.f32 %v885_v31, %v805_v10  ;;  %v541_v1 = vmul.f32 %v2074_v25, %v2484_v45  ;;  %v1292_v12 = vrot.slane %v1237_v48, 2 }
  0x7a   : > { %v518_v53 = vmul.f32 %v2071_v24, %v2484_v45  ;;  %v666_v32 = vmul.f32 %v2076_v26, %v2484_v45  ;;  %v827_v23 = vmul.f32 %v2095_v34, %v2399_v3  ;;  %v1169_v54 = vsel %vm580_vm2, %v1166_v38, %v1168_v51 }
  0x7b   : > { %v1338_v52 = vadd.f32 %v1296_v47, %v1214_v14  ;;  %v1053_v46 = vadd.f32 %v1009_v62, %v929_v15  ;;  %v596_v59 = vrot.slane %v541_v1, 1  ;;  %v788_v2 = vmul.f32 %v2092_v33, %v2399_v3 }
  0x7c   : > { %v721_v29 = vrot.slane %v666_v32, 2  ;;  %v881_v4 = vrot.slane %v827_v23, 1  ;;  %v951_v5 = vmul.f32 %v2107_v40, %v2399_v3  ;;  %v1111_v58 = vmul.f32 %v2113_v42, %v2309_v22 }
  0x7d   : > { %1696 = vmatpush3.xpose.msk.msra.mxu0 %vm435_vm0, %v1338_v52  ;;  %v1089_v8 = vadd.f32 %v1073_v50, %v1053_v46  ;;  %v598_v7 = vsel %vm580_vm2, %v596_v59, %v597_v61  ;;  %v1235_v16 = vmul.f32 %v2115_v43, %v2309_v22  ;;  %v1293_v63 = vsel %vm705_vm3, %v1290_v39, %v1292_v12 }
  0x7e   : > { %1697 = vmatprep.subr.mxu0 %v1889_v0  ;;  %v643_v19 = vadd.f32 %v598_v7, %v518_v53  ;;  %v723_v49 = vsel %vm705_vm3, %v721_v29, %v722_v6  ;;  %v1005_v61 = vrot.slane %v951_v5, 2  ;;  %v883_v57 = vsel %vm580_vm2, %v881_v4, %v882_v20 }
  0x7f   : > { %v1213_v11 = vadd.f32 %v1169_v54, %v1089_v8  ;;  %v1072_v21 = vmul.f32 %v2110_v41, %v2309_v22  ;;  %v1165_v44 = vrot.slane %v1111_v58, 1  ;;  %v1289_v28 = vrot.slane %v1235_v16, 2 }
  0x80   : > { %v768_v13 = vadd.f32 %v723_v49, %v643_v19  ;;  %v2529_v31 = vmul.f32 %v2074_v25, %v2515_v56  ;;  %v540_v35 = vmul.f32 %v2074_v25, %v2517_v17  ;;  %v1007_v6 = vsel %vm705_vm3, %v1005_v61, %v1006_v27 }
  0x81   : > { %v1337_v18 = vadd.f32 %v1293_v63, %v1213_v11  ;;  %v517_v30 = vmul.f32 %v2071_v24, %v2515_v56  ;;  %v2538_v20 = vmul.f32 %v2076_v26, %v2515_v56  ;;  %v665_v48 = vmul.f32 %v2076_v26, %v2517_v17  ;;  %v2572_v63 = vld [vmem:[#allocation2 + $0x30] sm:$0xff] }
  0x82   : > { %v804_v22 = vadd.f32 %v788_v2, %v768_v13  ;;  %v592_v47 = vrot.slane %v2529_v31, 1  ;;  %v594_v10 = vrot.slane %v540_v35, 1  ;;  %v787_v27 = vmul.f32 %v2092_v33, %v2426_v36 }
  0x83   : > { %1698 = vmatpush3.xpose.msk.msra.mxu0 %vm435_vm0, %v1337_v18  ;;  %v717_v62 = vrot.slane %v2538_v20, 2  ;;  %v825_v50 = vmul.f32 %v2095_v34, %v2426_v36  ;;  %v826_v51 = vmul.f32 %v2095_v34, %v2428_v37  ;;  %v719_v1 = vrot.slane %v665_v48, 2 }
  0x84   : > { %1699 = vmatprep.subr.mxu0 %v1889_v0  ;;  %v928_v14 = vadd.f32 %v883_v57, %v804_v22  ;;  %v595_v15 = vsel %vm580_vm2, %v592_v47, %v594_v10  ;;  %v949_v12 = vmul.f32 %v2107_v40, %v2426_v36  ;;  %v950_v52 = vmul.f32 %v2107_v40, %v2428_v37 }
  0x85   : > { %v642_v53 = vadd.f32 %v595_v15, %v517_v30  ;;  %v877_v32 = vrot.slane %v825_v50, 1  ;;  %v879_v23 = vrot.slane %v826_v51, 1  ;;  %v1167_v54 = vsel %vm580_vm2, %v1165_v44, %v1166_v38  ;;  %v2602_v51 = vld [vmem:[#allocation2 + $0x20] sm:$0xff] }
  0x86   : > { %v1052_v46 = vadd.f32 %v1007_v6, %v928_v14  ;;  %v720_v59 = vsel %vm705_vm3, %v717_v62, %v719_v1  ;;  %v1001_v29 = vrot.slane %v949_v12, 2  ;;  %v1003_v5 = vrot.slane %v950_v52, 2 }
  0x87   : > { %v767_v2 = vadd.f32 %v720_v59, %v642_v53  ;;  %v880_v4 = vsel %vm580_vm2, %v877_v32, %v879_v23  ;;  %v2562_v8 = vmul.f32 %v2113_v42, %v2335_v55  ;;  %v1110_v58 = vmul.f32 %v2113_v42, %v2342_v9  ;;  %v2607_v53 = vld [vmem:[#allocation2 + $0x28] sm:$0x3] }
  0x88   : > { %v1088_v7 = vadd.f32 %v1072_v21, %v1052_v46  ;;  %v2568_v16 = vmul.f32 %v2115_v43, %v2335_v55  ;;  %v1234_v38 = vmul.f32 %v2115_v43, %v2342_v9  ;;  %v1291_v19 = vsel %vm705_vm3, %v1289_v28, %v1290_v39 }
  0x89   : > { %v803_v49 = vadd.f32 %v787_v27, %v767_v2  ;;  %v1004_v61 = vsel %vm705_vm3, %v1001_v29, %v1003_v5  ;;  %v1071_v11 = vmul.f32 %v2110_v41, %v2335_v55  ;;  %v1161_v21 = vrot.slane %v2562_v8, 1 }
  0x8a   : > { %v1212_v57 = vadd.f32 %v1167_v54, %v1088_v7  ;;  %v1163_v44 = vrot.slane %v1110_v58, 1  ;;  %v516_v13 = vmul.f32 %v2071_v24, %v2572_v63  ;;  %v1285_v31 = vrot.slane %v2568_v16, 2 }
  0x8b   : > { %v927_v9 = vadd.f32 %v880_v4, %v803_v49  ;;  %v538_v60 = vmul.f32 %v2074_v25, %v2572_v63  ;;  %v663_v39 = vmul.f32 %v2076_v26, %v2572_v63  ;;  %v1287_v35 = vrot.slane %v1234_v38, 2 }
  0x8c   : > { %v1336_v28 = vadd.f32 %v1291_v19, %v1212_v57  ;;  %v786_v55 = vmul.f32 %v2092_v33, %v2484_v45  ;;  %v824_v18 = vmul.f32 %v2095_v34, %v2484_v45  ;;  %v948_v22 = vmul.f32 %v2107_v40, %v2484_v45 }
  0x8d   : > { %v1051_v6 = vadd.f32 %v1004_v61, %v927_v9  ;;  %v591_v30 = vrot.slane %v538_v60, 1  ;;  %v716_v20 = vrot.slane %v663_v39, 2  ;;  %v1164_v10 = vsel %vm580_vm2, %v1161_v21, %v1163_v44 }
  0x8e   : > { %1700 = vmatpush3.xpose.msk.msra.mxu0 %vm435_vm0, %v1336_v28  ;;  %v876_v48 = vrot.slane %v824_v18, 1  ;;  %v1108_v27 = vmul.f32 %v2113_v42, %v2399_v3  ;;  %v1232_v50 = vmul.f32 %v2115_v43, %v2399_v3  ;;  %v1000_v12 = vrot.slane %v948_v22, 2 }
  0x8f   : > { %1701 = vmatprep.subr.mxu0 %v1889_v0  ;;  %v1087_v14 = vadd.f32 %v1071_v11, %v1051_v6  ;;  %v593_v15 = vsel %vm580_vm2, %v591_v30, %v592_v47  ;;  %v718_v1 = vsel %vm705_vm3, %v716_v20, %v717_v62  ;;  %v1288_v23 = vsel %vm705_vm3, %v1285_v31, %v1287_v35 }
  0x90   : > { %v641_v52 = vadd.f32 %v593_v15, %v516_v13  ;;  %v878_v46 = vsel %vm580_vm2, %v876_v48, %v877_v32  ;;  %v1070_v54 = vmul.f32 %v2110_v41, %v2399_v3  ;;  %v1160_v2 = vrot.slane %v1108_v27, 1  ;;  %v2658_v15 = vld [vmem:[#allocation2 + $0x18] sm:$0xff] }
  0x91   : > { %v1211_v59 = vadd.f32 %v1164_v10, %v1087_v14  ;;  %v1284_v4 = vrot.slane %v1232_v50, 2  ;;  %v2615_v5 = vmul.f32 %v2074_v25, %v2602_v51  ;;  %v1002_v62 = vsel %vm705_vm3, %v1000_v12, %v1001_v29 }
  0x92   : > { %v766_v47 = vadd.f32 %v718_v1, %v641_v52  ;;  %v515_v7 = vmul.f32 %v2071_v24, %v2602_v51  ;;  %v537_v58 = vmul.f32 %v2074_v25, %v2607_v53  ;;  %v661_v3 = vmul.f32 %v2076_v26, %v2602_v51 }
  0x93   : > { %v1335_v32 = vadd.f32 %v1288_v23, %v1211_v59  ;;  %v587_v16 = vrot.slane %v2615_v5, 1  ;;  %v662_v38 = vmul.f32 %v2076_v26, %v2607_v53  ;;  %v785_v29 = vmul.f32 %v2092_v33, %v2515_v56 }
  0x94   : > { %v802_v19 = vadd.f32 %v786_v55, %v766_v47  ;;  %v589_v49 = vrot.slane %v537_v58, 1  ;;  %v822_v61 = vmul.f32 %v2095_v34, %v2515_v56  ;;  %v712_v11 = vrot.slane %v661_v3, 2 }
  0x95   : > { %1702 = vmatpush3.xpose.msk.msra.mxu0 %vm435_vm0, %v1335_v32  ;;  %v714_v57 = vrot.slane %v662_v38, 2  ;;  %v823_v44 = vmul.f32 %v2095_v34, %v2517_v17  ;;  %v2636_v13 = vmul.f32 %v2107_v40, %v2515_v56  ;;  %v947_v28 = vmul.f32 %v2107_v40, %v2517_v17 }
  0x96   : > { %1703 = vmatprep.subr.mxu0 %v1889_v0  ;;  %v926_v9 = vadd.f32 %v878_v46, %v802_v19  ;;  %v590_v60 = vsel %vm580_vm2, %v587_v16, %v589_v49  ;;  %v872_v39 = vrot.slane %v822_v61, 1  ;;  %v1162_v20 = vsel %vm580_vm2, %v1160_v2, %v1161_v21 }
  0x97   : > { %v640_v35 = vadd.f32 %v590_v60, %v515_v7  ;;  %v715_v55 = vsel %vm705_vm3, %v712_v11, %v714_v57  ;;  %v874_v18 = vrot.slane %v823_v44, 1  ;;  %v996_v6 = vrot.slane %v2636_v13, 2 }
  0x98   : > { %v1050_v30 = vadd.f32 %v1002_v62, %v926_v9  ;;  %v998_v22 = vrot.slane %v947_v28, 2  ;;  %v2649_v10 = vmul.f32 %v2113_v42, %v2426_v36  ;;  %v1286_v48 = vsel %vm705_vm3, %v1284_v4, %v1285_v31  ;;  %v477_v9 = vld [vmem:[#allocation2 + $0x10] sm:$0x3] }
  0x99   : > { %v765_v27 = vadd.f32 %v715_v55, %v640_v35  ;;  %v1107_v50 = vmul.f32 %v2113_v42, %v2428_v37  ;;  %v2656_v14 = vmul.f32 %v2115_v43, %v2426_v36  ;;  %v875_v21 = vsel %vm580_vm2, %v872_v39, %v874_v18 }
  0x9a   : > { %v1086_v8 = vadd.f32 %v1070_v54, %v1050_v30  ;;  %v1156_v1 = vrot.slane %v2649_v10, 1  ;;  %v1231_v12 = vmul.f32 %v2115_v43, %v2428_v37  ;;  %v999_v31 = vsel %vm705_vm3, %v996_v6, %v998_v22 }
  0x9b   : > { %v801_v23 = vadd.f32 %v785_v29, %v765_v27  ;;  %v1069_v52 = vmul.f32 %v2110_v41, %v2426_v36  ;;  %v1158_v46 = vrot.slane %v1107_v50, 1  ;;  %v1280_v2 = vrot.slane %v2656_v14, 2  ;;  %v476_v29 = vld [vmem:[#allocation2 + $0x8] sm:$0xff] }
  0x9c   : > { %v1210_v59 = vadd.f32 %v1162_v20, %v1086_v8  ;;  %v535_v54 = vmul.f32 %v2074_v25, %v2658_v15  ;;  %v660_v4 = vmul.f32 %v2076_v26, %v2658_v15  ;;  %v1282_v47 = vrot.slane %v1231_v12, 2 }
  0x9d   : > { %v925_v5 = vadd.f32 %v875_v21, %v801_v23  ;;  %v514_v37 = vmul.f32 %v2071_v24, %v2658_v15  ;;  %v821_v62 = vmul.f32 %v2095_v34, %v2572_v63  ;;  %v1159_v36 = vsel %vm580_vm2, %v1156_v1, %v1158_v46 }
  0x9e   : > { %v1334_v7 = vadd.f32 %v1286_v48, %v1210_v59  ;;  %v586_v58 = vrot.slane %v535_v54, 1  ;;  %v711_v32 = vrot.slane %v660_v4, 2  ;;  %v784_v38 = vmul.f32 %v2092_v33, %v2572_v63 }
  0x9f   : > { %v1049_v3 = vadd.f32 %v999_v31, %v925_v5  ;;  %v871_v19 = vrot.slane %v821_v62, 1  ;;  %v945_v49 = vmul.f32 %v2107_v40, %v2572_v63  ;;  %v1105_v44 = vmul.f32 %v2113_v42, %v2484_v45 }
  0xa0   : > { %1704 = vmatpush3.xpose.msk.msra.mxu0 %vm435_vm0, %v1334_v7  ;;  %v588_v61 = vsel %vm580_vm2, %v586_v58, %v587_v16  ;;  %v713_v57 = vsel %vm705_vm3, %v711_v32, %v712_v11  ;;  %v1229_v13 = vmul.f32 %v2115_v43, %v2484_v45  ;;  %v1283_v28 = vsel %vm705_vm3, %v1280_v2, %v1282_v47 }
  0xa1   : > { %1705 = vmatprep.subr.mxu0 %v1889_v0  ;;  %v1085_v60 = vadd.f32 %v1069_v52, %v1049_v3  ;;  %v639_v35 = vadd.f32 %v588_v61, %v514_v37  ;;  %v995_v55 = vrot.slane %v945_v49, 2  ;;  %v873_v16 = vsel %vm580_vm2, %v871_v19, %v872_v39 }
  0xa2   : > { %v1068_v11 = vmul.f32 %v2110_v41, %v2484_v45  ;;  %v1155_v18 = vrot.slane %v1105_v44, 1  ;;  %v2698_v30 = vmul.f32 %v2074_v25, %v476_v29  ;;  %v1279_v48 = vrot.slane %v1229_v13, 2 }
  0xa3   : > { %v1209_v20 = vadd.f32 %v1159_v36, %v1085_v60  ;;  %v764_v22 = vadd.f32 %v713_v57, %v639_v35  ;;  %v534_v27 = vmul.f32 %v2074_v25, %v477_v9  ;;  %v997_v50 = vsel %vm705_vm3, %v995_v55, %v996_v6  ;;  %v475_v57 = vld [vmem:[#allocation2] sm:$0xff] }
  0xa4   : > { %v513_v8 = vmul.f32 %v2071_v24, %v476_v29  ;;  %v582_v21 = vrot.slane %v2698_v30, 1  ;;  %v658_v39 = vmul.f32 %v2076_v26, %v476_v29  ;;  %v659_v31 = vmul.f32 %v2076_v26, %v477_v9 }
  0xa5   : > { %v1333_v12 = vadd.f32 %v1283_v28, %v1209_v20  ;;  %v800_v23 = vadd.f32 %v784_v38, %v764_v22  ;;  %v584_v45 = vrot.slane %v534_v27, 1  ;;  %v783_v46 = vmul.f32 %v2092_v33, %v2602_v51 }
  0xa6   : > { %v707_v52 = vrot.slane %v658_v39, 2  ;;  %v2710_v59 = vmul.f32 %v2095_v34, %v2602_v51  ;;  %v820_v6 = vmul.f32 %v2095_v34, %v2607_v53  ;;  %v709_v5 = vrot.slane %v659_v31, 2 }
  0xa7   : > { %1706 = vmatpush3.xpose.msk.msra.mxu0 %vm435_vm0, %v1333_v12  ;;  %v924_v54 = vadd.f32 %v873_v16, %v800_v23  ;;  %v585_v4 = vsel %vm580_vm2, %v582_v21, %v584_v45  ;;  %v2718_v47 = vmul.f32 %v2107_v40, %v2602_v51  ;;  %v944_v36 = vmul.f32 %v2107_v40, %v2607_v53  ;;  %v1347_v23 = vld [vmem:[%s2837_s5] sm:$0xff] }
  0xa8   : > { %1707 = vmatprep.subr.mxu0 %v1889_v0  ;;  %v638_v37 = vadd.f32 %v585_v4, %v513_v8  ;;  %v867_v62 = vrot.slane %v2710_v59, 1  ;;  %v869_v7 = vrot.slane %v820_v6, 1  ;;  %v1157_v32 = vsel %vm580_vm2, %v1155_v18, %v1156_v1 }
  0xa9   : > { %v1048_v58 = vadd.f32 %v997_v50, %v924_v54  ;;  %v710_v3 = vsel %vm705_vm3, %v707_v52, %v709_v5  ;;  %v991_v38 = vrot.slane %v2718_v47, 2  ;;  %v993_v49 = vrot.slane %v944_v36, 2 }
  0xaa   : > { %v763_v51 = vadd.f32 %v710_v3, %v638_v37  ;;  %v870_v19 = vsel %vm580_vm2, %v867_v62, %v869_v7  ;;  %v1103_v29 = vmul.f32 %v2113_v42, %v2515_v56  ;;  %v1104_v53 = vmul.f32 %v2113_v42, %v2517_v17 }
  0xab   : > { %v1084_v61 = vadd.f32 %v1068_v11, %v1048_v58  ;;  %v1227_v10 = vmul.f32 %v2115_v43, %v2515_v56  ;;  %v1228_v1 = vmul.f32 %v2115_v43, %v2517_v17  ;;  %v1281_v44 = vsel %vm705_vm3, %v1279_v48, %v1280_v2 }
  0xac   : > { %v799_v13 = vadd.f32 %v783_v46, %v763_v51  ;;  %v1067_v9 = vmul.f32 %v2110_v41, %v2515_v56  ;;  %v994_v28 = vsel %vm705_vm3, %v991_v38, %v993_v49  ;;  %v1151_v35 = vrot.slane %v1103_v29, 1 }
  0xad   : > { %v1208_v60 = vadd.f32 %v1157_v32, %v1084_v61  ;;  %v1153_v55 = vrot.slane %v1104_v53, 1  ;;  %v512_v11 = vmul.f32 %v2071_v24, %v475_v57  ;;  %v532_v18 = vmul.f32 %v2074_v25, %v475_v57 }
  0xae   : > { %v923_v16 = vadd.f32 %v870_v19, %v799_v13  ;;  %v657_v17 = vmul.f32 %v2076_v26, %v475_v57  ;;  %v1275_v14 = vrot.slane %v1227_v10, 2  ;;  %v1277_v20 = vrot.slane %v1228_v1, 2 }
  0xaf   : > { %v1332_v30 = vadd.f32 %v1281_v44, %v1208_v60  ;;  %v818_v2 = vmul.f32 %v2095_v34, %v2658_v15  ;;  %v581_v56 = vrot.slane %v532_v18, 1  ;;  %v942_v27 = vmul.f32 %v2107_v40, %v2658_v15 }
  0xb0   : > { %v1047_v22 = vadd.f32 %v994_v28, %v923_v16  ;;  %v706_v48 = vrot.slane %v657_v17, 2  ;;  %v1154_v24 = vsel %vm580_vm2, %v1151_v35, %v1153_v55  ;;  %v1278_v34 = vsel %vm705_vm3, %v1275_v14, %v1277_v20 }
  0xb1   : > { %1708 = vmatpush3.xpose.msk.msra.mxu0 %vm435_vm0, %v1332_v30  ;;  %v583_v26 = vsel %vm580_vm2, %v581_v56, %v582_v21  ;;  %v866_v8 = vrot.slane %v818_v2, 1  ;;  %v782_v12 = vmul.f32 %v2092_v33, %v2658_v15  ;;  %v1102_v40 = vmul.f32 %v2113_v42, %v2572_v63 }
  0xb2   : > { %1709 = vmatprep.subr.mxu0 %v1889_v0  ;;  %v1083_v25 = vadd.f32 %v1067_v9, %v1047_v22  ;;  %v708_v50 = vsel %vm705_vm3, %v706_v48, %v707_v52  ;;  %v637_v39 = vadd.f32 %v583_v26, %v512_v11  ;;  %v990_v31 = vrot.slane %v942_v27, 2 }
  0xb3   : > { %v1891_v21 = vmov 0   ;;  %v868_v59 = vsel %vm580_vm2, %v866_v8, %v867_v62  ;;  %v1226_v33 = vmul.f32 %v2115_v43, %v2572_v63  ;;  %v1150_v6 = vrot.slane %v1102_v40, 1 }
  0xb4   : > { %v1207_v45 = vadd.f32 %v1154_v24, %v1083_v25  ;;  %v762_v46 = vadd.f32 %v708_v50, %v637_v39  ;;  %1794 = vset.pattern.permute.xlu0 %v1891_v21  ;;  %v992_v15 = vsel %vm705_vm3, %v990_v31, %v991_v38  ;;  %v1066_v4 = vmul.f32 %v2110_v41, %v2572_v63 }
  0xb5   : > { %1350 = vperm.xlu0 %1794, %v1347_v23   ;;  %v1274_v5 = vrot.slane %v1226_v33, 2  ;;  %v1152_v43 = vsel %vm580_vm2, %v1150_v6, %v1151_v35 }
  0xb6   : > { %v1331_v52 = vadd.f32 %v1278_v34, %v1207_v45  ;;  %v798_v42 = vadd.f32 %v782_v12, %v762_v46 }
  0xb7   : > { %v1276_v62 = vsel %vm705_vm3, %v1274_v5, %v1275_v14 }
  0xb8   : > { %1710 = vmatpush3.xpose.msk.msra.mxu0 %vm435_vm0, %v1331_v52  ;;  %v922_v54 = vadd.f32 %v868_v59, %v798_v42 }
  0xb9   : > { %1711 = vmatprep.subr.mxu0 %v1889_v0  ;;  %v1346_v0 = vld [vmem:[%s2836_s4] sm:$0xff] }
  0xba   : > { %v1046_v47 = vadd.f32 %v992_v15, %v922_v54 }
  0xbc   : > { %v1082_v37 = vadd.f32 %v1066_v4, %v1046_v47 }
  0xbe   : > { %v1206_v7 = vadd.f32 %v1152_v43, %v1082_v37 }
  0xc0   : > { %v1330_v36 = vadd.f32 %v1276_v62, %v1206_v7 }
  0xc2   : > { %1712 = vmatpush3.xpose.msk.msra.mxu0 %vm435_vm0, %v1330_v36 }
  0xc5   : > { %1714 = vmatmul.mubr.msk.f32.vlgmr.msra.gmra.mxu0 %vm435_vm0, %v1346_v0 }
 0x130   : > { %v1351_v41 = vpop.permute.xlu0 %1350 }
 0x185   : > { %v1470_v63 = vpop.f32.mrf.mxu0 }
 0x186   : > { %v1471_v58 = vadd.f32 %v1470_v63, %v1351_v41 }
 0x187   : > { %v1715_v32 = vpop.f32.mrf.mxu0 }
 0x188   : > { %1474 = vst [vmem:[%s361_s16] sm:$0xff] %v1471_v58 }
 0x189   : > { %1808 = shalt.err (!%p1805_p10)
}
 0x18a   : > { %s1809_s18 = scalar_lea.hbm %s2786_s7, 128  ;;  %s1813_s17 = scalar_lea.hbm %s2838_s6, 512 }
 0x18b   : > { %p1810_p11 = scmp.ne.s32.totalorder %s2786_s7, %s1809_s18  ;;  %p1814_p0 = scmp.lt.s32.totalorder %s2786_s7, %s2838_s6 }
 0x18c   : > { %p1815_p1 = scmp.lt.s32.totalorder %s1813_s17, %s1809_s18 }
 0x18d   : > { %p1811_p12 = pnand %p1810_p11, %p1979_p3 }
 0x18e   : > { %p1816_p2 = por %p1815_p1, %p1814_p0 }
 0x18f   : > { %p1812_p13 = pneg %p1811_p12 }
 0x191   : > { %p1817_p4 = pnand %p1816_p2, %p1812_p13 }
 0x193   : > { %1820 = shalt.err (!%p1817_p4)
}
 0x194   : > { %1720 = dma.vmem_to_hbm [thread:$0]  (%p1979_p3), %s1492_s19, 128, %s2786_s7, %s1476_s12  }
 0x195 PF: > { %p1726_p5 = scmp.ge.s32.totalorder %s1887_s28, 2  ;;  %s1503_s8 = sand.u32 1, %s1859_s21  }
 0x196   : > { %s1504_s9 = scalar_lea.sflag [#allocation4], %s1503_s8 }
 0x197   : > { %p1723_p6 = pnand %p1726_p5, %p1988_p8 }
 0x199   : > { %p1724_p7 = pneg %p1723_p6 }
 0x19b   : > { %1854 = dma.done.wait (%p1724_p7), %s1504_s9, 128  }
 0x19c   : > { %1856 = vsyncadd (%p1724_p7), %s1504_s9, 4294967168  ;;  %s19_s28 = sadd.s32 1, %s1887_s28   ;;  %s2846_s10 = sld [smem:[#allocation6_spill]] }
 0x19d   : > { %p16_p9 = scmp.ge.s32.totalorder %s19_s28, 6   ;;  %s2847_s19 = sld [smem:[#allocation7_spill]] }
 0x19e   : > { %s2848_s21 = smov %s1863_s22  ;;  %s2849_s22 = smov %s1867_s23 }
 0x19f   : > { %s2850_s23 = smov %s1997_s15  ;;  %s2851_s24 = smov %s1879_s26 }
 0x1a0   : > { %s2852_s25 = smov %s1883_s27  ;;  %18 = sbr.rel (!%p16_p9) target bundleno = 5 (0x5), region = 87 }
 0x1a2   : > { %s2853_s26 = smov %s2846_s10 }
 0x1a3   : > { %s2854_s27 = smov %s2847_s19 }
 0x1a5   :  { %1509 = vsyncpa [#allocation4], 1 }
 0x1a6   :  { %1511 = vsyncpa [#allocation4 + $0x1], 1 }

</bundles_post_ra>
